<compile_context>
chip_gen: v6e
topology: v6e:2x2x1
jax: 0.10.0
libtpu: 0.0.40
codegen_flags: <defaults>
</compile_context>

<pallas_src>
import itertools

import numpy as np
import jax
import jax.numpy as jnp
from jax import lax
from jax.experimental import pallas as pl
from jax.experimental.pallas import tpu as pltpu

FOCAL_ALPHA = 0.25                      # focal_alpha in SetCriterion.__init__
W_CLASS, W_BBOX, W_GIOU = 2.0, 5.0, 2.0  # deformable-DETR Hungarian matcher cost weights
EPS = 1e-7

_VMEM = pl.BlockSpec(memory_space=pltpu.MemorySpace.VMEM)
_SMEM = pl.BlockSpec(memory_space=pltpu.MemorySpace.SMEM)
# explicit scoped-VMEM budget (fits v7x's 64 MiB physical / 32 MiB default; harmless on v5e/v6e)
_CPARAMS = pltpu.CompilerParams(vmem_limit_bytes=32 * 1024 * 1024)


def _sq(v):
    # gamma == 2 everywhere; explicit square avoids float-pow lowering
    return v * v


# --------------------------- Kernel A: matcher cost matrix (batched, fused) ---------------------------
def _cost_kernel(logits_t_ref, laboh_ref, pb_ref, tb_ref, cost_ref):
    xt = logits_t_ref[...]          # [B, C, Q]  logits transposed (Q lane-dense)
    laboh = laboh_ref[...]          # [B, T, C]  one-hot target labels
    pb = pb_ref[...]                # [B, 4, 1, Q] predicted boxes, coords on sublanes
    tb = tb_ref[...]                # [B, 4, T, 1] target boxes, coords on sublanes

    # focal class cost; column gather done as a one-hot matmul on the MXU
    prob = jax.nn.sigmoid(xt)
    neg = (1.0 - FOCAL_ALPHA) * _sq(prob) * (-jnp.log(1.0 - prob + 1e-8))
    pos = FOCAL_ALPHA * _sq(1.0 - prob) * (-jnp.log(prob + 1e-8))
    cost_class = jnp.einsum('btc,bcq->btq', laboh, pos - neg,
                            preferred_element_type=jnp.float32)        # [B, T, Q]

    # pairwise L1 cost: [B,1,Q] x [B,T,1] broadcasts (no width-1 lane slices)
    cost_bbox = (jnp.abs(pb[:, 0] - tb[:, 0]) + jnp.abs(pb[:, 1] - tb[:, 1]) +
                 jnp.abs(pb[:, 2] - tb[:, 2]) + jnp.abs(pb[:, 3] - tb[:, 3]))

    # pairwise GIoU cost (cxcywh -> xyxy)
    ox0 = pb[:, 0] - 0.5 * pb[:, 2]; oy0 = pb[:, 1] - 0.5 * pb[:, 3]
    ox1 = pb[:, 0] + 0.5 * pb[:, 2]; oy1 = pb[:, 1] + 0.5 * pb[:, 3]
    tx0 = tb[:, 0] - 0.5 * tb[:, 2]; ty0 = tb[:, 1] - 0.5 * tb[:, 3]
    tx1 = tb[:, 0] + 0.5 * tb[:, 2]; ty1 = tb[:, 1] + 0.5 * tb[:, 3]
    area_o = (ox1 - ox0) * (oy1 - oy0)           # [B, 1, Q]
    area_t = (tx1 - tx0) * (ty1 - ty0)           # [B, T, 1]
    iw = jnp.maximum(jnp.minimum(ox1, tx1) - jnp.maximum(ox0, tx0), 0.0)
    ih = jnp.maximum(jnp.minimum(oy1, ty1) - jnp.maximum(oy0, ty0), 0.0)
    inter = iw * ih                              # [B, T, Q]
    union = area_o + area_t - inter
    iou = inter / (union + EPS)
    cw = jnp.maximum(jnp.maximum(ox1, tx1) - jnp.minimum(ox0, tx0), 0.0)
    ch = jnp.maximum(jnp.maximum(oy1, ty1) - jnp.minimum(oy0, ty0), 0.0)
    carea = cw * ch
    giou = iou - (carea - union) / (carea + EPS)

    cost_ref[...] = W_BBOX * cost_bbox + W_CLASS * cost_class + W_GIOU * (-giou)


def matcher_cost(logits_t, laboh, pb4, tb4):
    B, _, Q = logits_t.shape
    T = laboh.shape[1]
    return pl.pallas_call(
        _cost_kernel,
        out_shape=jax.ShapeDtypeStruct((B, T, Q), jnp.float32),   # Q on lanes (lane-dense at real sizes)
        in_specs=[_VMEM, _VMEM, _VMEM, _VMEM],
        out_specs=_VMEM,
        compiler_params=_CPARAMS,
    )(logits_t, laboh, pb4, tb4)


# --------------------------- Kernel B: all losses, fused ---------------------------
def _loss_kernel(logits_ref, srcoh_ref, laboh_ref, pbt_ref, tbt_ref, nb_ref,
                 lce_ref, lbbox_ref, lgiou_ref, cerr_ref, carderr_ref):
    x = logits_ref[...]            # [B, Q, C]
    srcoh = srcoh_ref[...]         # [B, T, Q] one-hot matched query per target
    laboh = laboh_ref[...]         # [B, T, C] one-hot target labels
    pbt = pbt_ref[...]             # [B, 4, Q] predicted boxes, coords on sublanes
    tbt = tbt_ref[...]             # [B, 4, T] matched target boxes, coords on sublanes
    nb = nb_ref[0]
    B, Q, C = x.shape
    T = laboh.shape[1]

    # ---- loss_ce (sigmoid focal): sum over all positions with target=0, plus a correction
    #      at the (few) matched positive positions -> no dense [B,Q,C] one-hot needed ----
    p = jax.nn.sigmoid(x)
    sp = jnp.log1p(jnp.exp(-jnp.abs(x)))              # log(1 + exp(-|x|))
    relu_x = jnp.maximum(x, 0.0)
    fl_neg_all = (1.0 - FOCAL_ALPHA) * _sq(p) * (relu_x + sp)
    sum_neg = jnp.sum(fl_neg_all)

    ml = jnp.einsum('btq,bqc->btc', srcoh, x,
                    preferred_element_type=jnp.float32)   # matched logits [B, T, C]
    pm = jax.nn.sigmoid(ml)
    spm = jnp.log1p(jnp.exp(-jnp.abs(ml)))
    relu_m = jnp.maximum(ml, 0.0)
    fl1_m = FOCAL_ALPHA * _sq(1.0 - pm) * (relu_m - ml + spm)      # FL(x, target=1)
    fl0_m = (1.0 - FOCAL_ALPHA) * _sq(pm) * (relu_m + spm)         # FL(x, target=0)
    corr = jnp.sum(laboh * (fl1_m - fl0_m))
    # torch: sigmoid_focal_loss(...).mean(1).sum() / num_boxes * Q  ==  sum(FL) / num_boxes
    lce_ref[0] = (sum_neg + corr) / nb

    # ---- cardinality error (vectorized over batch): argmax != last class
    #      <=>  max over first C-1 logits >= last logit (ties -> first index, counted) ----
    front_max = jnp.max(x[..., :C - 1], axis=-1)                   # [B, Q]
    last = x[..., C - 1]                                           # [B, Q]
    is_obj = (front_max >= last).astype(jnp.float32)
    card = jnp.sum(is_obj, axis=-1, keepdims=True)                 # [B, 1]
    carderr_ref[0] = jnp.sum(jnp.abs(card - float(T))) / float(B)

    # ---- matched box L1 + GIoU (matched pred boxes gathered via one-hot matmul) ----
    mpb = jnp.einsum('bkq,btq->bkt', pbt, srcoh,
                     preferred_element_type=jnp.float32)           # [B, 4, T]
    lbbox_ref[0] = jnp.sum(jnp.abs(mpb - tbt)) / nb

    sx0 = mpb[:, 0] - 0.5 * mpb[:, 2]; sy0 = mpb[:, 1] - 0.5 * mpb[:, 3]
    sx1 = mpb[:, 0] + 0.5 * mpb[:, 2]; sy1 = mpb[:, 1] + 0.5 * mpb[:, 3]
    tx0 = tbt[:, 0] - 0.5 * tbt[:, 2]; ty0 = tbt[:, 1] - 0.5 * tbt[:, 3]
    tx1 = tbt[:, 0] + 0.5 * tbt[:, 2]; ty1 = tbt[:, 1] + 0.5 * tbt[:, 3]
    area_s = (sx1 - sx0) * (sy1 - sy0)
    area_t = (tx1 - tx0) * (ty1 - ty0)
    iw = jnp.maximum(jnp.minimum(sx1, tx1) - jnp.maximum(sx0, tx0), 0.0)
    ih = jnp.maximum(jnp.minimum(sy1, ty1) - jnp.maximum(sy0, ty0), 0.0)
    inter = iw * ih
    union = area_s + area_t - inter
    iou = inter / (union + EPS)
    cw = jnp.maximum(jnp.maximum(sx1, tx1) - jnp.minimum(sx0, tx0), 0.0)
    ch = jnp.maximum(jnp.maximum(sy1, ty1) - jnp.minimum(sy0, ty0), 0.0)
    carea = cw * ch
    giou = iou - (carea - union) / (carea + EPS)                   # [B, T] (diag of pairwise GIoU)
    lgiou_ref[0] = jnp.sum(1.0 - giou) / nb

    # ---- class_error = 100 - top1 accuracy of matched logits vs matched labels ----
    iota_c = lax.broadcasted_iota(jnp.int32, (B, T, C), 2)
    mx = jnp.max(ml, axis=-1, keepdims=True)
    pred = jnp.min(jnp.where(ml == mx, iota_c, C), axis=-1, keepdims=True)   # first argmax
    lbl = jnp.min(jnp.where(laboh > 0.5, iota_c, C), axis=-1, keepdims=True)
    correct = jnp.sum((pred == lbl).astype(jnp.float32))
    cerr_ref[0] = 100.0 - correct * (100.0 / float(B * T))


def fused_losses(pred_logits, srcoh, laboh, pbt, tbt, num_boxes):
    scalar = jax.ShapeDtypeStruct((1,), jnp.float32)
    return pl.pallas_call(
        _loss_kernel,
        out_shape=(scalar, scalar, scalar, scalar, scalar),
        in_specs=[_VMEM, _VMEM, _VMEM, _VMEM, _VMEM, _SMEM],
        out_specs=(_SMEM, _SMEM, _SMEM, _SMEM, _SMEM),
        compiler_params=_CPARAMS,
    )(pred_logits, srcoh, laboh, pbt, tbt, num_boxes)


# --------------------------- on-device exact assignment (matcher) ---------------------------
def _permutation_tables(Q, T):
    # Exact assignment by exhaustive enumeration of all ordered selections of T distinct
    # queries (same optimum as scipy.optimize.linear_sum_assignment).  Tables are static
    # (depend only on Q, T), built once at trace time -- no host sync at run time.
    # TODO(synk): only tractable for small Q/T; real DETR (Q=300) needs a true LAP solver.
    perms = np.asarray(list(itertools.permutations(range(Q), T)), dtype=np.int32)   # [P, T]
    perm_oh = np.eye(Q, dtype=np.float32)[perms]                                    # [P, T, Q]
    return jnp.asarray(perms), jnp.asarray(perm_oh)


# --------------------------- SetCriterion.forward (losses = labels/boxes/cardinality) ---------------------------
@jax.jit
def set_criterion_forward(pred_logits, pred_boxes, tgt_labels, tgt_boxes):
    B, Q, C = pred_logits.shape
    T = tgt_labels.shape[1]

    # on-device layout prep (cheap XLA transposes / one-hots, no host transfers)
    laboh = jax.nn.one_hot(tgt_labels, C, dtype=jnp.float32)   # [B, T, C]
    logits_t = jnp.swapaxes(pred_logits, 1, 2)                 # [B, C, Q]
    pbt = jnp.swapaxes(pred_boxes, 1, 2)                       # [B, 4, Q]
    tbt = jnp.swapaxes(tgt_boxes, 1, 2)                        # [B, 4, T]

    # (A) matcher cost matrix in Pallas
    cost = matcher_cost(logits_t, laboh, pbt[:, :, None, :], tbt[:, :, :, None])   # [B, T, Q]

    # exact Hungarian assignment, fully on device: score every candidate assignment
    perm_tbl, perm_oh = _permutation_tables(Q, T)
    scores = jnp.einsum('btq,ptq->bp', cost, perm_oh)          # [B, P]
    best = jnp.argmin(scores, axis=-1)                         # [B]
    src_idx = jnp.take(perm_tbl, best, axis=0)                 # [B, T] matched query per target
    srcoh = jax.nn.one_hot(src_idx, Q, dtype=jnp.float32)      # [B, T, Q]

    # num_boxes (single process: no all_reduce), clamp(min=1)
    num_boxes = jnp.asarray([max(float(B * T), 1.0)], jnp.float32)

    # (B) all losses in one fused Pallas kernel
    loss_ce, loss_bbox, loss_giou, class_error, card_err = fused_losses(
        pred_logits, srcoh, laboh, pbt, tbt, num_boxes)

    # TODO(synk): loss_masks / loss_attens (NestedTensor, interpolate, gaussian_filter) and
    # the aux_outputs / enc_outputs loops are not implemented here.
    return {
        "loss_ce": loss_ce[0],
        "class_error": class_error[0],
        "cardinality_error": card_err[0],
        "loss_bbox": loss_bbox[0],
        "loss_giou": loss_giou[0],
    }


if __name__ == "__main__":
    key = jax.random.PRNGKey(0)
    B, Q, C, T = 2, 8, 4, 3
    k1, k2, k3, k4, k5, k6 = jax.random.split(key, 6)

    pred_logits = jax.random.normal(k1, (B, Q, C), jnp.float32)
    pred_cxy = jax.random.uniform(k2, (B, Q, 2), minval=0.25, maxval=0.75)
    pred_wh = jax.random.uniform(k3, (B, Q, 2), minval=0.1, maxval=0.4)
    pred_boxes = jnp.concatenate([pred_cxy, pred_wh], axis=-1)

    tgt_labels = jax.random.randint(k4, (B, T), 0, C, dtype=jnp.int32)
    tgt_cxy = jax.random.uniform(k5, (B, T, 2), minval=0.25, maxval=0.75)
    tgt_wh = jax.random.uniform(k6, (B, T, 2), minval=0.1, maxval=0.4)
    tgt_boxes = jnp.concatenate([tgt_cxy, tgt_wh], axis=-1)

    losses = set_criterion_forward(pred_logits, pred_boxes, tgt_labels, tgt_boxes)
    losses = {k: jax.block_until_ready(v) for k, v in losses.items()}
    for k, v in losses.items():
        assert bool(jnp.isfinite(v)), f"non-finite loss {k}"
    print("KERNEL_OK")
</pallas_src>

<mosaic_0001>
module attributes {stable_mosaic.version = 11 : i64} {
  func.func @_cost_kernel(%arg0: memref<2x4x8xf32, #tpu.memory_space<vmem>>, %arg1: memref<2x3x4xf32, #tpu.memory_space<vmem>>, %arg2: memref<2x4x1x8xf32, #tpu.memory_space<vmem>>, %arg3: memref<2x4x3x1xf32, #tpu.memory_space<vmem>>, %arg4: memref<2x3x8xf32, #tpu.memory_space<vmem>>) attributes {dimension_semantics = [], scalar_prefetch = 0 : i64, scratch_operands = 0 : i64, tpu.core_type = #tpu.core_type<tc>} {
    %c0 = arith.constant 0 : index
    %c0_0 = arith.constant 0 : index
    %c0_1 = arith.constant 0 : index
    %0 = vector.load %arg0[%c0, %c0_0, %c0_1] : memref<2x4x8xf32, #tpu.memory_space<vmem>>, vector<2x4x8xf32>
    %c0_2 = arith.constant 0 : index
    %c0_3 = arith.constant 0 : index
    %c0_4 = arith.constant 0 : index
    %1 = vector.load %arg1[%c0_2, %c0_3, %c0_4] : memref<2x3x4xf32, #tpu.memory_space<vmem>>, vector<2x3x4xf32>
    %c0_5 = arith.constant 0 : index
    %c0_6 = arith.constant 0 : index
    %c0_7 = arith.constant 0 : index
    %c0_8 = arith.constant 0 : index
    %2 = vector.load %arg2[%c0_5, %c0_6, %c0_7, %c0_8] : memref<2x4x1x8xf32, #tpu.memory_space<vmem>>, vector<2x4x1x8xf32>
    %c0_9 = arith.constant 0 : index
    %c0_10 = arith.constant 0 : index
    %c0_11 = arith.constant 0 : index
    %c0_12 = arith.constant 0 : index
    %3 = vector.load %arg3[%c0_9, %c0_10, %c0_11, %c0_12] : memref<2x4x3x1xf32, #tpu.memory_space<vmem>>, vector<2x4x3x1xf32>
    %4 = arith.negf %0 : vector<2x4x8xf32>
    %5 = math.exp %4 : vector<2x4x8xf32>
    %cst = arith.constant 1.000000e+00 : f32
    %6 = vector.broadcast %cst : f32 to vector<2x4x8xf32>
    %7 = arith.addf %6, %5 : vector<2x4x8xf32>
    %8 = arith.divf %6, %7 : vector<2x4x8xf32>
    %9 = arith.mulf %8, %8 : vector<2x4x8xf32>
    %cst_13 = arith.constant 7.500000e-01 : f32
    %10 = vector.broadcast %cst_13 : f32 to vector<2x4x8xf32>
    %11 = arith.mulf %10, %9 : vector<2x4x8xf32>
    %cst_14 = arith.constant 1.000000e+00 : f32
    %12 = vector.broadcast %cst_14 : f32 to vector<2x4x8xf32>
    %13 = arith.subf %12, %8 : vector<2x4x8xf32>
    %cst_15 = arith.constant 9.99999993E-9 : f32
    %14 = vector.broadcast %cst_15 : f32 to vector<2x4x8xf32>
    %15 = arith.addf %13, %14 : vector<2x4x8xf32>
    %16 = math.log %15 : vector<2x4x8xf32>
    %cst_16 = arith.constant 0.000000e+00 : f32
    %17 = vector.broadcast %cst_16 : f32 to vector<2x4x8xf32>
    %18 = arith.subf %17, %16 : vector<2x4x8xf32>
    %19 = arith.mulf %11, %18 : vector<2x4x8xf32>
    %cst_17 = arith.constant 1.000000e+00 : f32
    %20 = vector.broadcast %cst_17 : f32 to vector<2x4x8xf32>
    %21 = arith.subf %20, %8 : vector<2x4x8xf32>
    %22 = arith.mulf %21, %21 : vector<2x4x8xf32>
    %cst_18 = arith.constant 2.500000e-01 : f32
    %23 = vector.broadcast %cst_18 : f32 to vector<2x4x8xf32>
    %24 = arith.mulf %23, %22 : vector<2x4x8xf32>
    %cst_19 = arith.constant 9.99999993E-9 : f32
    %25 = vector.broadcast %cst_19 : f32 to vector<2x4x8xf32>
    %26 = arith.addf %8, %25 : vector<2x4x8xf32>
    %27 = math.log %26 : vector<2x4x8xf32>
    %cst_20 = arith.constant 0.000000e+00 : f32
    %28 = vector.broadcast %cst_20 : f32 to vector<2x4x8xf32>
    %29 = arith.subf %28, %27 : vector<2x4x8xf32>
    %30 = arith.mulf %24, %29 : vector<2x4x8xf32>
    %31 = arith.subf %30, %19 : vector<2x4x8xf32>
    "tpu.trace_start"() <{level = 10 : i32, message = "btc,bcq->btq"}> : () -> ()
    %cst_21 = arith.constant dense<0.000000e+00> : vector<2x3x8xf32>
    %32 = tpu.matmul %1, %31, %cst_21 {dimension_numbers = #tpu.dot_dimension_numbers<[2], [1], [1], [2], [0, 0, 0, 1, 1, 2], [0], [0]>} : vector<2x3x4xf32>, vector<2x4x8xf32>, vector<2x3x8xf32> -> vector<2x3x8xf32>
    "tpu.trace_stop"() : () -> ()
    %33 = vector.extract_strided_slice %2 {offsets = [0, 0, 0, 0], sizes = [2, 1, 1, 8], strides = [1, 1, 1, 1]} : vector<2x4x1x8xf32> to vector<2x1x1x8xf32>
    %34 = vector.shape_cast %33 : vector<2x1x1x8xf32> to vector<2x1x8xf32>
    %35 = vector.extract_strided_slice %3 {offsets = [0, 0, 0, 0], sizes = [2, 1, 3, 1], strides = [1, 1, 1, 1]} : vector<2x4x3x1xf32> to vector<2x1x3x1xf32>
    %36 = vector.shape_cast %35 : vector<2x1x3x1xf32> to vector<2x3x1xf32>
    %37 = vector.broadcast %34 : vector<2x1x8xf32> to vector<2x3x8xf32>
    %38 = vector.broadcast %36 : vector<2x3x1xf32> to vector<2x3x8xf32>
    %39 = arith.subf %37, %38 : vector<2x3x8xf32>
    %40 = math.absf %39 : vector<2x3x8xf32>
    %41 = vector.extract_strided_slice %2 {offsets = [0, 1, 0, 0], sizes = [2, 1, 1, 8], strides = [1, 1, 1, 1]} : vector<2x4x1x8xf32> to vector<2x1x1x8xf32>
    %42 = vector.shape_cast %41 : vector<2x1x1x8xf32> to vector<2x1x8xf32>
    %43 = vector.extract_strided_slice %3 {offsets = [0, 1, 0, 0], sizes = [2, 1, 3, 1], strides = [1, 1, 1, 1]} : vector<2x4x3x1xf32> to vector<2x1x3x1xf32>
    %44 = vector.shape_cast %43 : vector<2x1x3x1xf32> to vector<2x3x1xf32>
    %45 = vector.broadcast %42 : vector<2x1x8xf32> to vector<2x3x8xf32>
    %46 = vector.broadcast %44 : vector<2x3x1xf32> to vector<2x3x8xf32>
    %47 = arith.subf %45, %46 : vector<2x3x8xf32>
    %48 = math.absf %47 : vector<2x3x8xf32>
    %49 = arith.addf %40, %48 : vector<2x3x8xf32>
    %50 = vector.extract_strided_slice %2 {offsets = [0, 2, 0, 0], sizes = [2, 1, 1, 8], strides = [1, 1, 1, 1]} : vector<2x4x1x8xf32> to vector<2x1x1x8xf32>
    %51 = vector.shape_cast %50 : vector<2x1x1x8xf32> to vector<2x1x8xf32>
    %52 = vector.extract_strided_slice %3 {offsets = [0, 2, 0, 0], sizes = [2, 1, 3, 1], strides = [1, 1, 1, 1]} : vector<2x4x3x1xf32> to vector<2x1x3x1xf32>
    %53 = vector.shape_cast %52 : vector<2x1x3x1xf32> to vector<2x3x1xf32>
    %54 = vector.broadcast %51 : vector<2x1x8xf32> to vector<2x3x8xf32>
    %55 = vector.broadcast %53 : vector<2x3x1xf32> to vector<2x3x8xf32>
    %56 = arith.subf %54, %55 : vector<2x3x8xf32>
    %57 = math.absf %56 : vector<2x3x8xf32>
    %58 = arith.addf %49, %57 : vector<2x3x8xf32>
    %59 = vector.extract_strided_slice %2 {offsets = [0, 3, 0, 0], sizes = [2, 1, 1, 8], strides = [1, 1, 1, 1]} : vector<2x4x1x8xf32> to vector<2x1x1x8xf32>
    %60 = vector.shape_cast %59 : vector<2x1x1x8xf32> to vector<2x1x8xf32>
    %61 = vector.extract_strided_slice %3 {offsets = [0, 3, 0, 0], sizes = [2, 1, 3, 1], strides = [1, 1, 1, 1]} : vector<2x4x3x1xf32> to vector<2x1x3x1xf32>
    %62 = vector.shape_cast %61 : vector<2x1x3x1xf32> to vector<2x3x1xf32>
    %63 = vector.broadcast %60 : vector<2x1x8xf32> to vector<2x3x8xf32>
    %64 = vector.broadcast %62 : vector<2x3x1xf32> to vector<2x3x8xf32>
    %65 = arith.subf %63, %64 : vector<2x3x8xf32>
    %66 = math.absf %65 : vector<2x3x8xf32>
    %67 = arith.addf %58, %66 : vector<2x3x8xf32>
    %68 = vector.extract_strided_slice %2 {offsets = [0, 0, 0, 0], sizes = [2, 1, 1, 8], strides = [1, 1, 1, 1]} : vector<2x4x1x8xf32> to vector<2x1x1x8xf32>
    %69 = vector.shape_cast %68 : vector<2x1x1x8xf32> to vector<2x1x8xf32>
    %70 = vector.extract_strided_slice %2 {offsets = [0, 2, 0, 0], sizes = [2, 1, 1, 8], strides = [1, 1, 1, 1]} : vector<2x4x1x8xf32> to vector<2x1x1x8xf32>
    %71 = vector.shape_cast %70 : vector<2x1x1x8xf32> to vector<2x1x8xf32>
    %cst_22 = arith.constant 5.000000e-01 : f32
    %72 = vector.broadcast %cst_22 : f32 to vector<2x1x8xf32>
    %73 = arith.mulf %72, %71 : vector<2x1x8xf32>
    %74 = arith.subf %69, %73 : vector<2x1x8xf32>
    %75 = vector.extract_strided_slice %2 {offsets = [0, 1, 0, 0], sizes = [2, 1, 1, 8], strides = [1, 1, 1, 1]} : vector<2x4x1x8xf32> to vector<2x1x1x8xf32>
    %76 = vector.shape_cast %75 : vector<2x1x1x8xf32> to vector<2x1x8xf32>
    %77 = vector.extract_strided_slice %2 {offsets = [0, 3, 0, 0], sizes = [2, 1, 1, 8], strides = [1, 1, 1, 1]} : vector<2x4x1x8xf32> to vector<2x1x1x8xf32>
    %78 = vector.shape_cast %77 : vector<2x1x1x8xf32> to vector<2x1x8xf32>
    %cst_23 = arith.constant 5.000000e-01 : f32
    %79 = vector.broadcast %cst_23 : f32 to vector<2x1x8xf32>
    %80 = arith.mulf %79, %78 : vector<2x1x8xf32>
    %81 = arith.subf %76, %80 : vector<2x1x8xf32>
    %82 = vector.extract_strided_slice %2 {offsets = [0, 0, 0, 0], sizes = [2, 1, 1, 8], strides = [1, 1, 1, 1]} : vector<2x4x1x8xf32> to vector<2x1x1x8xf32>
    %83 = vector.shape_cast %82 : vector<2x1x1x8xf32> to vector<2x1x8xf32>
    %84 = vector.extract_strided_slice %2 {offsets = [0, 2, 0, 0], sizes = [2, 1, 1, 8], strides = [1, 1, 1, 1]} : vector<2x4x1x8xf32> to vector<2x1x1x8xf32>
    %85 = vector.shape_cast %84 : vector<2x1x1x8xf32> to vector<2x1x8xf32>
    %cst_24 = arith.constant 5.000000e-01 : f32
    %86 = vector.broadcast %cst_24 : f32 to vector<2x1x8xf32>
    %87 = arith.mulf %86, %85 : vector<2x1x8xf32>
    %88 = arith.addf %83, %87 : vector<2x1x8xf32>
    %89 = vector.extract_strided_slice %2 {offsets = [0, 1, 0, 0], sizes = [2, 1, 1, 8], strides = [1, 1, 1, 1]} : vector<2x4x1x8xf32> to vector<2x1x1x8xf32>
    %90 = vector.shape_cast %89 : vector<2x1x1x8xf32> to vector<2x1x8xf32>
    %91 = vector.extract_strided_slice %2 {offsets = [0, 3, 0, 0], sizes = [2, 1, 1, 8], strides = [1, 1, 1, 1]} : vector<2x4x1x8xf32> to vector<2x1x1x8xf32>
    %92 = vector.shape_cast %91 : vector<2x1x1x8xf32> to vector<2x1x8xf32>
    %cst_25 = arith.constant 5.000000e-01 : f32
    %93 = vector.broadcast %cst_25 : f32 to vector<2x1x8xf32>
    %94 = arith.mulf %93, %92 : vector<2x1x8xf32>
    %95 = arith.addf %90, %94 : vector<2x1x8xf32>
    %96 = vector.extract_strided_slice %3 {offsets = [0, 0, 0, 0], sizes = [2, 1, 3, 1], strides = [1, 1, 1, 1]} : vector<2x4x3x1xf32> to vector<2x1x3x1xf32>
    %97 = vector.shape_cast %96 : vector<2x1x3x1xf32> to vector<2x3x1xf32>
    %98 = vector.extract_strided_slice %3 {offsets = [0, 2, 0, 0], sizes = [2, 1, 3, 1], strides = [1, 1, 1, 1]} : vector<2x4x3x1xf32> to vector<2x1x3x1xf32>
    %99 = vector.shape_cast %98 : vector<2x1x3x1xf32> to vector<2x3x1xf32>
    %cst_26 = arith.constant 5.000000e-01 : f32
    %100 = vector.broadcast %cst_26 : f32 to vector<2x3x1xf32>
    %101 = arith.mulf %100, %99 : vector<2x3x1xf32>
    %102 = arith.subf %97, %101 : vector<2x3x1xf32>
    %103 = vector.extract_strided_slice %3 {offsets = [0, 1, 0, 0], sizes = [2, 1, 3, 1], strides = [1, 1, 1, 1]} : vector<2x4x3x1xf32> to vector<2x1x3x1xf32>
    %104 = vector.shape_cast %103 : vector<2x1x3x1xf32> to vector<2x3x1xf32>
    %105 = vector.extract_strided_slice %3 {offsets = [0, 3, 0, 0], sizes = [2, 1, 3, 1], strides = [1, 1, 1, 1]} : vector<2x4x3x1xf32> to vector<2x1x3x1xf32>
    %106 = vector.shape_cast %105 : vector<2x1x3x1xf32> to vector<2x3x1xf32>
    %cst_27 = arith.constant 5.000000e-01 : f32
    %107 = vector.broadcast %cst_27 : f32 to vector<2x3x1xf32>
    %108 = arith.mulf %107, %106 : vector<2x3x1xf32>
    %109 = arith.subf %104, %108 : vector<2x3x1xf32>
    %110 = vector.extract_strided_slice %3 {offsets = [0, 0, 0, 0], sizes = [2, 1, 3, 1], strides = [1, 1, 1, 1]} : vector<2x4x3x1xf32> to vector<2x1x3x1xf32>
    %111 = vector.shape_cast %110 : vector<2x1x3x1xf32> to vector<2x3x1xf32>
    %112 = vector.extract_strided_slice %3 {offsets = [0, 2, 0, 0], sizes = [2, 1, 3, 1], strides = [1, 1, 1, 1]} : vector<2x4x3x1xf32> to vector<2x1x3x1xf32>
    %113 = vector.shape_cast %112 : vector<2x1x3x1xf32> to vector<2x3x1xf32>
    %cst_28 = arith.constant 5.000000e-01 : f32
    %114 = vector.broadcast %cst_28 : f32 to vector<2x3x1xf32>
    %115 = arith.mulf %114, %113 : vector<2x3x1xf32>
    %116 = arith.addf %111, %115 : vector<2x3x1xf32>
    %117 = vector.extract_strided_slice %3 {offsets = [0, 1, 0, 0], sizes = [2, 1, 3, 1], strides = [1, 1, 1, 1]} : vector<2x4x3x1xf32> to vector<2x1x3x1xf32>
    %118 = vector.shape_cast %117 : vector<2x1x3x1xf32> to vector<2x3x1xf32>
    %119 = vector.extract_strided_slice %3 {offsets = [0, 3, 0, 0], sizes = [2, 1, 3, 1], strides = [1, 1, 1, 1]} : vector<2x4x3x1xf32> to vector<2x1x3x1xf32>
    %120 = vector.shape_cast %119 : vector<2x1x3x1xf32> to vector<2x3x1xf32>
    %cst_29 = arith.constant 5.000000e-01 : f32
    %121 = vector.broadcast %cst_29 : f32 to vector<2x3x1xf32>
    %122 = arith.mulf %121, %120 : vector<2x3x1xf32>
    %123 = arith.addf %118, %122 : vector<2x3x1xf32>
    %124 = arith.subf %88, %74 : vector<2x1x8xf32>
    %125 = arith.subf %95, %81 : vector<2x1x8xf32>
    %126 = arith.mulf %124, %125 : vector<2x1x8xf32>
    %127 = arith.subf %116, %102 : vector<2x3x1xf32>
    %128 = arith.subf %123, %109 : vector<2x3x1xf32>
    %129 = arith.mulf %127, %128 : vector<2x3x1xf32>
    %130 = vector.broadcast %88 : vector<2x1x8xf32> to vector<2x3x8xf32>
    %131 = vector.broadcast %116 : vector<2x3x1xf32> to vector<2x3x8xf32>
    %132 = arith.minimumf %130, %131 : vector<2x3x8xf32>
    %133 = vector.broadcast %74 : vector<2x1x8xf32> to vector<2x3x8xf32>
    %134 = vector.broadcast %102 : vector<2x3x1xf32> to vector<2x3x8xf32>
    %135 = arith.maximumf %133, %134 : vector<2x3x8xf32>
    %136 = arith.subf %132, %135 : vector<2x3x8xf32>
    %cst_30 = arith.constant 0.000000e+00 : f32
    %137 = vector.broadcast %cst_30 : f32 to vector<2x3x8xf32>
    %138 = arith.maximumf %136, %137 : vector<2x3x8xf32>
    %139 = vector.broadcast %95 : vector<2x1x8xf32> to vector<2x3x8xf32>
    %140 = vector.broadcast %123 : vector<2x3x1xf32> to vector<2x3x8xf32>
    %141 = arith.minimumf %139, %140 : vector<2x3x8xf32>
    %142 = vector.broadcast %81 : vector<2x1x8xf32> to vector<2x3x8xf32>
    %143 = vector.broadcast %109 : vector<2x3x1xf32> to vector<2x3x8xf32>
    %144 = arith.maximumf %142, %143 : vector<2x3x8xf32>
    %145 = arith.subf %141, %144 : vector<2x3x8xf32>
    %cst_31 = arith.constant 0.000000e+00 : f32
    %146 = vector.broadcast %cst_31 : f32 to vector<2x3x8xf32>
    %147 = arith.maximumf %145, %146 : vector<2x3x8xf32>
    %148 = arith.mulf %138, %147 : vector<2x3x8xf32>
    %149 = vector.broadcast %126 : vector<2x1x8xf32> to vector<2x3x8xf32>
    %150 = vector.broadcast %129 : vector<2x3x1xf32> to vector<2x3x8xf32>
    %151 = arith.addf %149, %150 : vector<2x3x8xf32>
    %152 = arith.subf %151, %148 : vector<2x3x8xf32>
    %cst_32 = arith.constant 1.000000e-07 : f32
    %153 = vector.broadcast %cst_32 : f32 to vector<2x3x8xf32>
    %154 = arith.addf %152, %153 : vector<2x3x8xf32>
    %155 = arith.divf %148, %154 : vector<2x3x8xf32>
    %156 = vector.broadcast %88 : vector<2x1x8xf32> to vector<2x3x8xf32>
    %157 = vector.broadcast %116 : vector<2x3x1xf32> to vector<2x3x8xf32>
    %158 = arith.maximumf %156, %157 : vector<2x3x8xf32>
    %159 = vector.broadcast %74 : vector<2x1x8xf32> to vector<2x3x8xf32>
    %160 = vector.broadcast %102 : vector<2x3x1xf32> to vector<2x3x8xf32>
    %161 = arith.minimumf %159, %160 : vector<2x3x8xf32>
    %162 = arith.subf %158, %161 : vector<2x3x8xf32>
    %cst_33 = arith.constant 0.000000e+00 : f32
    %163 = vector.broadcast %cst_33 : f32 to vector<2x3x8xf32>
    %164 = arith.maximumf %162, %163 : vector<2x3x8xf32>
    %165 = vector.broadcast %95 : vector<2x1x8xf32> to vector<2x3x8xf32>
    %166 = vector.broadcast %123 : vector<2x3x1xf32> to vector<2x3x8xf32>
    %167 = arith.maximumf %165, %166 : vector<2x3x8xf32>
    %168 = vector.broadcast %81 : vector<2x1x8xf32> to vector<2x3x8xf32>
    %169 = vector.broadcast %109 : vector<2x3x1xf32> to vector<2x3x8xf32>
    %170 = arith.minimumf %168, %169 : vector<2x3x8xf32>
    %171 = arith.subf %167, %170 : vector<2x3x8xf32>
    %cst_34 = arith.constant 0.000000e+00 : f32
    %172 = vector.broadcast %cst_34 : f32 to vector<2x3x8xf32>
    %173 = arith.maximumf %171, %172 : vector<2x3x8xf32>
    %174 = arith.mulf %164, %173 : vector<2x3x8xf32>
    %175 = arith.subf %174, %152 : vector<2x3x8xf32>
    %cst_35 = arith.constant 1.000000e-07 : f32
    %176 = vector.broadcast %cst_35 : f32 to vector<2x3x8xf32>
    %177 = arith.addf %174, %176 : vector<2x3x8xf32>
    %178 = arith.divf %175, %177 : vector<2x3x8xf32>
    %179 = arith.subf %155, %178 : vector<2x3x8xf32>
    %cst_36 = arith.constant 5.000000e+00 : f32
    %180 = vector.broadcast %cst_36 : f32 to vector<2x3x8xf32>
    %181 = arith.mulf %180, %67 : vector<2x3x8xf32>
    %cst_37 = arith.constant 2.000000e+00 : f32
    %182 = vector.broadcast %cst_37 : f32 to vector<2x3x8xf32>
    %183 = arith.mulf %182, %32 : vector<2x3x8xf32>
    %184 = arith.addf %181, %183 : vector<2x3x8xf32>
    %cst_38 = arith.constant 0.000000e+00 : f32
    %185 = vector.broadcast %cst_38 : f32 to vector<2x3x8xf32>
    %186 = arith.subf %185, %179 : vector<2x3x8xf32>
    %cst_39 = arith.constant 2.000000e+00 : f32
    %187 = vector.broadcast %cst_39 : f32 to vector<2x3x8xf32>
    %188 = arith.mulf %187, %186 : vector<2x3x8xf32>
    %189 = arith.addf %184, %188 : vector<2x3x8xf32>
    %c0_40 = arith.constant 0 : index
    %c0_41 = arith.constant 0 : index
    %c0_42 = arith.constant 0 : index
    %190 = vector.load %arg4[%c0_40, %c0_41, %c0_42] : memref<2x3x8xf32, #tpu.memory_space<vmem>>, vector<2x3x8xf32>
    tpu.vector_store %arg4[%c0_40, %c0_41, %c0_42], %189 {strides = array<i32>} : memref<2x3x8xf32, #tpu.memory_space<vmem>>, vector<2x3x8xf32>,
    return
  }
}

module attributes {stable_mosaic.version = 11 : i64} {
  func.func @_loss_kernel(%arg0: memref<2x8x4xf32, #tpu.memory_space<vmem>>, %arg1: memref<2x3x8xf32, #tpu.memory_space<vmem>>, %arg2: memref<2x3x4xf32, #tpu.memory_space<vmem>>, %arg3: memref<2x4x8xf32, #tpu.memory_space<vmem>>, %arg4: memref<2x4x3xf32, #tpu.memory_space<vmem>>, %arg5: memref<1xf32, #tpu.memory_space<smem>>, %arg6: memref<1xf32, #tpu.memory_space<smem>>, %arg7: memref<1xf32, #tpu.memory_space<smem>>, %arg8: memref<1xf32, #tpu.memory_space<smem>>, %arg9: memref<1xf32, #tpu.memory_space<smem>>, %arg10: memref<1xf32, #tpu.memory_space<smem>>) attributes {dimension_semantics = [], scalar_prefetch = 0 : i64, scratch_operands = 0 : i64, tpu.core_type = #tpu.core_type<tc>} {
    %c0 = arith.constant 0 : index
    %c0_0 = arith.constant 0 : index
    %c0_1 = arith.constant 0 : index
    %0 = vector.load %arg0[%c0, %c0_0, %c0_1] : memref<2x8x4xf32, #tpu.memory_space<vmem>>, vector<2x8x4xf32>
    %c0_2 = arith.constant 0 : index
    %c0_3 = arith.constant 0 : index
    %c0_4 = arith.constant 0 : index
    %1 = vector.load %arg1[%c0_2, %c0_3, %c0_4] : memref<2x3x8xf32, #tpu.memory_space<vmem>>, vector<2x3x8xf32>
    %c0_5 = arith.constant 0 : index
    %c0_6 = arith.constant 0 : index
    %c0_7 = arith.constant 0 : index
    %2 = vector.load %arg2[%c0_5, %c0_6, %c0_7] : memref<2x3x4xf32, #tpu.memory_space<vmem>>, vector<2x3x4xf32>
    %c0_8 = arith.constant 0 : index
    %c0_9 = arith.constant 0 : index
    %c0_10 = arith.constant 0 : index
    %3 = vector.load %arg3[%c0_8, %c0_9, %c0_10] : memref<2x4x8xf32, #tpu.memory_space<vmem>>, vector<2x4x8xf32>
    %c0_11 = arith.constant 0 : index
    %c0_12 = arith.constant 0 : index
    %c0_13 = arith.constant 0 : index
    %4 = vector.load %arg4[%c0_11, %c0_12, %c0_13] : memref<2x4x3xf32, #tpu.memory_space<vmem>>, vector<2x4x3xf32>
    %c0_14 = arith.constant 0 : index
    %5 = memref.load %arg5[%c0_14] : memref<1xf32, #tpu.memory_space<smem>>
    %6 = arith.negf %0 : vector<2x8x4xf32>
    %7 = math.exp %6 : vector<2x8x4xf32>
    %cst = arith.constant 1.000000e+00 : f32
    %8 = vector.broadcast %cst : f32 to vector<2x8x4xf32>
    %9 = arith.addf %8, %7 : vector<2x8x4xf32>
    %10 = arith.divf %8, %9 : vector<2x8x4xf32>
    %11 = math.absf %0 : vector<2x8x4xf32>
    %cst_15 = arith.constant 0.000000e+00 : f32
    %12 = vector.broadcast %cst_15 : f32 to vector<2x8x4xf32>
    %13 = arith.subf %12, %11 : vector<2x8x4xf32>
    %14 = math.exp %13 : vector<2x8x4xf32>
    %15 = math.log1p %14 : vector<2x8x4xf32>
    %cst_16 = arith.constant 0.000000e+00 : f32
    %16 = vector.broadcast %cst_16 : f32 to vector<2x8x4xf32>
    %17 = arith.maximumf %0, %16 : vector<2x8x4xf32>
    %18 = arith.mulf %10, %10 : vector<2x8x4xf32>
    %cst_17 = arith.constant 7.500000e-01 : f32
    %19 = vector.broadcast %cst_17 : f32 to vector<2x8x4xf32>
    %20 = arith.mulf %19, %18 : vector<2x8x4xf32>
    %21 = arith.addf %17, %15 : vector<2x8x4xf32>
    %22 = arith.mulf %20, %21 : vector<2x8x4xf32>
    %23 = vector.shape_cast %22 : vector<2x8x4xf32> to vector<1x2x8x4xf32>
    %cst_18 = arith.constant dense<0.000000e+00> : vector<1xf32>
    %24 = vector.multi_reduction <add>, %23, %cst_18 [1, 2, 3] : vector<1x2x8x4xf32> to vector<1xf32>
    %25 = vector.shape_cast %24 : vector<1xf32> to vector<1x1x1x1xf32>
    %26 = vector.extract %25[0, 0, 0, 0] : f32 from vector<1x1x1x1xf32>
    "tpu.trace_start"() <{level = 10 : i32, message = "btq,bqc->btc"}> : () -> ()
    %cst_19 = arith.constant dense<0.000000e+00> : vector<2x3x4xf32>
    %27 = tpu.matmul %1, %0, %cst_19 {dimension_numbers = #tpu.dot_dimension_numbers<[2], [1], [1], [2], [0, 0, 0, 1, 1, 2], [0], [0]>} : vector<2x3x8xf32>, vector<2x8x4xf32>, vector<2x3x4xf32> -> vector<2x3x4xf32>
    "tpu.trace_stop"() : () -> ()
    %28 = arith.negf %27 : vector<2x3x4xf32>
    %29 = math.exp %28 : vector<2x3x4xf32>
    %cst_20 = arith.constant 1.000000e+00 : f32
    %30 = vector.broadcast %cst_20 : f32 to vector<2x3x4xf32>
    %31 = arith.addf %30, %29 : vector<2x3x4xf32>
    %32 = arith.divf %30, %31 : vector<2x3x4xf32>
    %33 = math.absf %27 : vector<2x3x4xf32>
    %cst_21 = arith.constant 0.000000e+00 : f32
    %34 = vector.broadcast %cst_21 : f32 to vector<2x3x4xf32>
    %35 = arith.subf %34, %33 : vector<2x3x4xf32>
    %36 = math.exp %35 : vector<2x3x4xf32>
    %37 = math.log1p %36 : vector<2x3x4xf32>
    %cst_22 = arith.constant 0.000000e+00 : f32
    %38 = vector.broadcast %cst_22 : f32 to vector<2x3x4xf32>
    %39 = arith.maximumf %27, %38 : vector<2x3x4xf32>
    %cst_23 = arith.constant 1.000000e+00 : f32
    %40 = vector.broadcast %cst_23 : f32 to vector<2x3x4xf32>
    %41 = arith.subf %40, %32 : vector<2x3x4xf32>
    %42 = arith.mulf %41, %41 : vector<2x3x4xf32>
    %cst_24 = arith.constant 2.500000e-01 : f32
    %43 = vector.broadcast %cst_24 : f32 to vector<2x3x4xf32>
    %44 = arith.mulf %43, %42 : vector<2x3x4xf32>
    %45 = arith.subf %39, %27 : vector<2x3x4xf32>
    %46 = arith.addf %45, %37 : vector<2x3x4xf32>
    %47 = arith.mulf %44, %46 : vector<2x3x4xf32>
    %48 = arith.mulf %32, %32 : vector<2x3x4xf32>
    %cst_25 = arith.constant 7.500000e-01 : f32
    %49 = vector.broadcast %cst_25 : f32 to vector<2x3x4xf32>
    %50 = arith.mulf %49, %48 : vector<2x3x4xf32>
    %51 = arith.addf %39, %37 : vector<2x3x4xf32>
    %52 = arith.mulf %50, %51 : vector<2x3x4xf32>
    %53 = arith.subf %47, %52 : vector<2x3x4xf32>
    %54 = arith.mulf %2, %53 : vector<2x3x4xf32>
    %55 = vector.shape_cast %54 : vector<2x3x4xf32> to vector<1x2x3x4xf32>
    %cst_26 = arith.constant dense<0.000000e+00> : vector<1xf32>
    %56 = vector.multi_reduction <add>, %55, %cst_26 [1, 2, 3] : vector<1x2x3x4xf32> to vector<1xf32>
    %57 = vector.shape_cast %56 : vector<1xf32> to vector<1x1x1x1xf32>
    %58 = vector.extract %57[0, 0, 0, 0] : f32 from vector<1x1x1x1xf32>
    %59 = arith.addf %26, %58 : f32
    %60 = arith.divf %59, %5 : f32
    %c0_27 = arith.constant 0 : index
    %61 = memref.load %arg6[%c0_27] : memref<1xf32, #tpu.memory_space<smem>>
    memref.store %60, %arg6[%c0_27] : memref<1xf32, #tpu.memory_space<smem>>
    %62 = vector.extract_strided_slice %0 {offsets = [0, 0, 0], sizes = [2, 8, 3], strides = [1, 1, 1]} : vector<2x8x4xf32> to vector<2x8x3xf32>
    %cst_28 = arith.constant dense<0xFF800000> : vector<2x8xf32>
    %63 = vector.multi_reduction <maximumf>, %62, %cst_28 [2] : vector<2x8x3xf32> to vector<2x8xf32>
    %64 = vector.extract_strided_slice %0 {offsets = [0, 0, 3], sizes = [2, 8, 1], strides = [1, 1, 1]} : vector<2x8x4xf32> to vector<2x8x1xf32>
    %65 = vector.shape_cast %64 : vector<2x8x1xf32> to vector<2x8xf32>
    %66 = arith.cmpf oge, %63, %65 : vector<2x8xf32>
    %67 = arith.extui %66 : vector<2x8xi1> to vector<2x8xi32>
    %68 = arith.sitofp %67 : vector<2x8xi32> to vector<2x8xf32>
    %cst_29 = arith.constant dense<0.000000e+00> : vector<2xf32>
    %69 = vector.multi_reduction <add>, %68, %cst_29 [1] : vector<2x8xf32> to vector<2xf32>
    %70 = vector.shape_cast %69 : vector<2xf32> to vector<2x1xf32>
    %cst_30 = arith.constant 3.000000e+00 : f32
    %71 = vector.broadcast %cst_30 : f32 to vector<2x1xf32>
    %72 = arith.subf %70, %71 : vector<2x1xf32>
    %73 = math.absf %72 : vector<2x1xf32>
    %74 = vector.shape_cast %73 : vector<2x1xf32> to vector<1x2x1xf32>
    %cst_31 = arith.constant dense<0.000000e+00> : vector<1xf32>
    %75 = vector.multi_reduction <add>, %74, %cst_31 [1, 2] : vector<1x2x1xf32> to vector<1xf32>
    %76 = vector.shape_cast %75 : vector<1xf32> to vector<1x1x1xf32>
    %77 = vector.extract %76[0, 0, 0] : f32 from vector<1x1x1xf32>
    %cst_32 = arith.constant 2.000000e+00 : f32
    %78 = arith.divf %77, %cst_32 : f32
    %c0_33 = arith.constant 0 : index
    %79 = memref.load %arg10[%c0_33] : memref<1xf32, #tpu.memory_space<smem>>
    memref.store %78, %arg10[%c0_33] : memref<1xf32, #tpu.memory_space<smem>>
    "tpu.trace_start"() <{level = 10 : i32, message = "bkq,btq->bkt"}> : () -> ()
    %cst_34 = arith.constant dense<0.000000e+00> : vector<2x4x3xf32>
    %80 = tpu.matmul %3, %1, %cst_34 {dimension_numbers = #tpu.dot_dimension_numbers<[2], [2], [1], [1], [0, 0, 0, 1, 1, 1], [0], [0]>} : vector<2x4x8xf32>, vector<2x3x8xf32>, vector<2x4x3xf32> -> vector<2x4x3xf32>
    "tpu.trace_stop"() : () -> ()
    %81 = arith.subf %80, %4 : vector<2x4x3xf32>
    %82 = math.absf %81 : vector<2x4x3xf32>
    %83 = vector.shape_cast %82 : vector<2x4x3xf32> to vector<1x2x4x3xf32>
    %cst_35 = arith.constant dense<0.000000e+00> : vector<1xf32>
    %84 = vector.multi_reduction <add>, %83, %cst_35 [1, 2, 3] : vector<1x2x4x3xf32> to vector<1xf32>
    %85 = vector.shape_cast %84 : vector<1xf32> to vector<1x1x1x1xf32>
    %86 = vector.extract %85[0, 0, 0, 0] : f32 from vector<1x1x1x1xf32>
    %87 = arith.divf %86, %5 : f32
    %c0_36 = arith.constant 0 : index
    %88 = memref.load %arg7[%c0_36] : memref<1xf32, #tpu.memory_space<smem>>
    memref.store %87, %arg7[%c0_36] : memref<1xf32, #tpu.memory_space<smem>>
    %89 = vector.extract_strided_slice %80 {offsets = [0, 0, 0], sizes = [2, 1, 3], strides = [1, 1, 1]} : vector<2x4x3xf32> to vector<2x1x3xf32>
    %90 = vector.shape_cast %89 : vector<2x1x3xf32> to vector<2x3xf32>
    %91 = vector.extract_strided_slice %80 {offsets = [0, 2, 0], sizes = [2, 1, 3], strides = [1, 1, 1]} : vector<2x4x3xf32> to vector<2x1x3xf32>
    %92 = vector.shape_cast %91 : vector<2x1x3xf32> to vector<2x3xf32>
    %cst_37 = arith.constant 5.000000e-01 : f32
    %93 = vector.broadcast %cst_37 : f32 to vector<2x3xf32>
    %94 = arith.mulf %93, %92 : vector<2x3xf32>
    %95 = arith.subf %90, %94 : vector<2x3xf32>
    %96 = vector.extract_strided_slice %80 {offsets = [0, 1, 0], sizes = [2, 1, 3], strides = [1, 1, 1]} : vector<2x4x3xf32> to vector<2x1x3xf32>
    %97 = vector.shape_cast %96 : vector<2x1x3xf32> to vector<2x3xf32>
    %98 = vector.extract_strided_slice %80 {offsets = [0, 3, 0], sizes = [2, 1, 3], strides = [1, 1, 1]} : vector<2x4x3xf32> to vector<2x1x3xf32>
    %99 = vector.shape_cast %98 : vector<2x1x3xf32> to vector<2x3xf32>
    %cst_38 = arith.constant 5.000000e-01 : f32
    %100 = vector.broadcast %cst_38 : f32 to vector<2x3xf32>
    %101 = arith.mulf %100, %99 : vector<2x3xf32>
    %102 = arith.subf %97, %101 : vector<2x3xf32>
    %103 = vector.extract_strided_slice %80 {offsets = [0, 0, 0], sizes = [2, 1, 3], strides = [1, 1, 1]} : vector<2x4x3xf32> to vector<2x1x3xf32>
    %104 = vector.shape_cast %103 : vector<2x1x3xf32> to vector<2x3xf32>
    %105 = vector.extract_strided_slice %80 {offsets = [0, 2, 0], sizes = [2, 1, 3], strides = [1, 1, 1]} : vector<2x4x3xf32> to vector<2x1x3xf32>
    %106 = vector.shape_cast %105 : vector<2x1x3xf32> to vector<2x3xf32>
    %cst_39 = arith.constant 5.000000e-01 : f32
    %107 = vector.broadcast %cst_39 : f32 to vector<2x3xf32>
    %108 = arith.mulf %107, %106 : vector<2x3xf32>
    %109 = arith.addf %104, %108 : vector<2x3xf32>
    %110 = vector.extract_strided_slice %80 {offsets = [0, 1, 0], sizes = [2, 1, 3], strides = [1, 1, 1]} : vector<2x4x3xf32> to vector<2x1x3xf32>
    %111 = vector.shape_cast %110 : vector<2x1x3xf32> to vector<2x3xf32>
    %112 = vector.extract_strided_slice %80 {offsets = [0, 3, 0], sizes = [2, 1, 3], strides = [1, 1, 1]} : vector<2x4x3xf32> to vector<2x1x3xf32>
    %113 = vector.shape_cast %112 : vector<2x1x3xf32> to vector<2x3xf32>
    %cst_40 = arith.constant 5.000000e-01 : f32
    %114 = vector.broadcast %cst_40 : f32 to vector<2x3xf32>
    %115 = arith.mulf %114, %113 : vector<2x3xf32>
    %116 = arith.addf %111, %115 : vector<2x3xf32>
    %117 = vector.extract_strided_slice %4 {offsets = [0, 0, 0], sizes = [2, 1, 3], strides = [1, 1, 1]} : vector<2x4x3xf32> to vector<2x1x3xf32>
    %118 = vector.shape_cast %117 : vector<2x1x3xf32> to vector<2x3xf32>
    %119 = vector.extract_strided_slice %4 {offsets = [0, 2, 0], sizes = [2, 1, 3], strides = [1, 1, 1]} : vector<2x4x3xf32> to vector<2x1x3xf32>
    %120 = vector.shape_cast %119 : vector<2x1x3xf32> to vector<2x3xf32>
    %cst_41 = arith.constant 5.000000e-01 : f32
    %121 = vector.broadcast %cst_41 : f32 to vector<2x3xf32>
    %122 = arith.mulf %121, %120 : vector<2x3xf32>
    %123 = arith.subf %118, %122 : vector<2x3xf32>
    %124 = vector.extract_strided_slice %4 {offsets = [0, 1, 0], sizes = [2, 1, 3], strides = [1, 1, 1]} : vector<2x4x3xf32> to vector<2x1x3xf32>
    %125 = vector.shape_cast %124 : vector<2x1x3xf32> to vector<2x3xf32>
    %126 = vector.extract_strided_slice %4 {offsets = [0, 3, 0], sizes = [2, 1, 3], strides = [1, 1, 1]} : vector<2x4x3xf32> to vector<2x1x3xf32>
    %127 = vector.shape_cast %126 : vector<2x1x3xf32> to vector<2x3xf32>
    %cst_42 = arith.constant 5.000000e-01 : f32
    %128 = vector.broadcast %cst_42 : f32 to vector<2x3xf32>
    %129 = arith.mulf %128, %127 : vector<2x3xf32>
    %130 = arith.subf %125, %129 : vector<2x3xf32>
    %131 = vector.extract_strided_slice %4 {offsets = [0, 0, 0], sizes = [2, 1, 3], strides = [1, 1, 1]} : vector<2x4x3xf32> to vector<2x1x3xf32>
    %132 = vector.shape_cast %131 : vector<2x1x3xf32> to vector<2x3xf32>
    %133 = vector.extract_strided_slice %4 {offsets = [0, 2, 0], sizes = [2, 1, 3], strides = [1, 1, 1]} : vector<2x4x3xf32> to vector<2x1x3xf32>
    %134 = vector.shape_cast %133 : vector<2x1x3xf32> to vector<2x3xf32>
    %cst_43 = arith.constant 5.000000e-01 : f32
    %135 = vector.broadcast %cst_43 : f32 to vector<2x3xf32>
    %136 = arith.mulf %135, %134 : vector<2x3xf32>
    %137 = arith.addf %132, %136 : vector<2x3xf32>
    %138 = vector.extract_strided_slice %4 {offsets = [0, 1, 0], sizes = [2, 1, 3], strides = [1, 1, 1]} : vector<2x4x3xf32> to vector<2x1x3xf32>
    %139 = vector.shape_cast %138 : vector<2x1x3xf32> to vector<2x3xf32>
    %140 = vector.extract_strided_slice %4 {offsets = [0, 3, 0], sizes = [2, 1, 3], strides = [1, 1, 1]} : vector<2x4x3xf32> to vector<2x1x3xf32>
    %141 = vector.shape_cast %140 : vector<2x1x3xf32> to vector<2x3xf32>
    %cst_44 = arith.constant 5.000000e-01 : f32
    %142 = vector.broadcast %cst_44 : f32 to vector<2x3xf32>
    %143 = arith.mulf %142, %141 : vector<2x3xf32>
    %144 = arith.addf %139, %143 : vector<2x3xf32>
    %145 = arith.subf %109, %95 : vector<2x3xf32>
    %146 = arith.subf %116, %102 : vector<2x3xf32>
    %147 = arith.mulf %145, %146 : vector<2x3xf32>
    %148 = arith.subf %137, %123 : vector<2x3xf32>
    %149 = arith.subf %144, %130 : vector<2x3xf32>
    %150 = arith.mulf %148, %149 : vector<2x3xf32>
    %151 = arith.minimumf %109, %137 : vector<2x3xf32>
    %152 = arith.maximumf %95, %123 : vector<2x3xf32>
    %153 = arith.subf %151, %152 : vector<2x3xf32>
    %cst_45 = arith.constant 0.000000e+00 : f32
    %154 = vector.broadcast %cst_45 : f32 to vector<2x3xf32>
    %155 = arith.maximumf %153, %154 : vector<2x3xf32>
    %156 = arith.minimumf %116, %144 : vector<2x3xf32>
    %157 = arith.maximumf %102, %130 : vector<2x3xf32>
    %158 = arith.subf %156, %157 : vector<2x3xf32>
    %cst_46 = arith.constant 0.000000e+00 : f32
    %159 = vector.broadcast %cst_46 : f32 to vector<2x3xf32>
    %160 = arith.maximumf %158, %159 : vector<2x3xf32>
    %161 = arith.mulf %155, %160 : vector<2x3xf32>
    %162 = arith.addf %147, %150 : vector<2x3xf32>
    %163 = arith.subf %162, %161 : vector<2x3xf32>
    %cst_47 = arith.constant 1.000000e-07 : f32
    %164 = vector.broadcast %cst_47 : f32 to vector<2x3xf32>
    %165 = arith.addf %163, %164 : vector<2x3xf32>
    %166 = arith.divf %161, %165 : vector<2x3xf32>
    %167 = arith.maximumf %109, %137 : vector<2x3xf32>
    %168 = arith.minimumf %95, %123 : vector<2x3xf32>
    %169 = arith.subf %167, %168 : vector<2x3xf32>
    %cst_48 = arith.constant 0.000000e+00 : f32
    %170 = vector.broadcast %cst_48 : f32 to vector<2x3xf32>
    %171 = arith.maximumf %169, %170 : vector<2x3xf32>
    %172 = arith.maximumf %116, %144 : vector<2x3xf32>
    %173 = arith.minimumf %102, %130 : vector<2x3xf32>
    %174 = arith.subf %172, %173 : vector<2x3xf32>
    %cst_49 = arith.constant 0.000000e+00 : f32
    %175 = vector.broadcast %cst_49 : f32 to vector<2x3xf32>
    %176 = arith.maximumf %174, %175 : vector<2x3xf32>
    %177 = arith.mulf %171, %176 : vector<2x3xf32>
    %178 = arith.subf %177, %163 : vector<2x3xf32>
    %cst_50 = arith.constant 1.000000e-07 : f32
    %179 = vector.broadcast %cst_50 : f32 to vector<2x3xf32>
    %180 = arith.addf %177, %179 : vector<2x3xf32>
    %181 = arith.divf %178, %180 : vector<2x3xf32>
    %182 = arith.subf %166, %181 : vector<2x3xf32>
    %cst_51 = arith.constant 1.000000e+00 : f32
    %183 = vector.broadcast %cst_51 : f32 to vector<2x3xf32>
    %184 = arith.subf %183, %182 : vector<2x3xf32>
    %185 = vector.shape_cast %184 : vector<2x3xf32> to vector<1x2x3xf32>
    %cst_52 = arith.constant dense<0.000000e+00> : vector<1xf32>
    %186 = vector.multi_reduction <add>, %185, %cst_52 [1, 2] : vector<1x2x3xf32> to vector<1xf32>
    %187 = vector.shape_cast %186 : vector<1xf32> to vector<1x1x1xf32>
    %188 = vector.extract %187[0, 0, 0] : f32 from vector<1x1x1xf32>
    %189 = arith.divf %188, %5 : f32
    %c0_53 = arith.constant 0 : index
    %190 = memref.load %arg8[%c0_53] : memref<1xf32, #tpu.memory_space<smem>>
    memref.store %189, %arg8[%c0_53] : memref<1xf32, #tpu.memory_space<smem>>
    %191 = tpu.iota {dimensions = array<i32: 2>} : vector<2x3x4xi32>
    %cst_54 = arith.constant dense<0xFF800000> : vector<2x3xf32>
    %192 = vector.multi_reduction <maximumf>, %27, %cst_54 [2] : vector<2x3x4xf32> to vector<2x3xf32>
    %193 = vector.shape_cast %192 : vector<2x3xf32> to vector<2x3x1xf32>
    %194 = vector.broadcast %193 : vector<2x3x1xf32> to vector<2x3x4xf32>
    %195 = arith.cmpf oeq, %27, %194 : vector<2x3x4xf32>
    %c4_i32 = arith.constant 4 : i32
    %196 = vector.broadcast %c4_i32 : i32 to vector<2x3x4xi32>
    %197 = arith.select %195, %191, %196 : vector<2x3x4xi1>, vector<2x3x4xi32>
    %cst_55 = arith.constant dense<2147483647> : vector<2x3xi32>
    %198 = vector.multi_reduction <minsi>, %197, %cst_55 [2] : vector<2x3x4xi32> to vector<2x3xi32>
    %199 = vector.shape_cast %198 : vector<2x3xi32> to vector<2x3x1xi32>
    %cst_56 = arith.constant 5.000000e-01 : f32
    %200 = vector.broadcast %cst_56 : f32 to vector<2x3x4xf32>
    %201 = arith.cmpf ogt, %2, %200 : vector<2x3x4xf32>
    %c4_i32_57 = arith.constant 4 : i32
    %202 = vector.broadcast %c4_i32_57 : i32 to vector<2x3x4xi32>
    %203 = arith.select %201, %191, %202 : vector<2x3x4xi1>, vector<2x3x4xi32>
    %cst_58 = arith.constant dense<2147483647> : vector<2x3xi32>
    %204 = vector.multi_reduction <minsi>, %203, %cst_58 [2] : vector<2x3x4xi32> to vector<2x3xi32>
    %205 = vector.shape_cast %204 : vector<2x3xi32> to vector<2x3x1xi32>
    %206 = arith.cmpi eq, %199, %205 : vector<2x3x1xi32>
    %207 = arith.extui %206 : vector<2x3x1xi1> to vector<2x3x1xi32>
    %208 = arith.sitofp %207 : vector<2x3x1xi32> to vector<2x3x1xf32>
    %209 = vector.shape_cast %208 : vector<2x3x1xf32> to vector<1x2x3x1xf32>
    %cst_59 = arith.constant dense<0.000000e+00> : vector<1xf32>
    %210 = vector.multi_reduction <add>, %209, %cst_59 [1, 2, 3] : vector<1x2x3x1xf32> to vector<1xf32>
    %211 = vector.shape_cast %210 : vector<1xf32> to vector<1x1x1x1xf32>
    %212 = vector.extract %211[0, 0, 0, 0] : f32 from vector<1x1x1x1xf32>
    %cst_60 = arith.constant 16.666666 : f32
    %213 = arith.mulf %212, %cst_60 : f32
    %cst_61 = arith.constant 1.000000e+02 : f32
    %214 = arith.subf %cst_61, %213 : f32
    %c0_62 = arith.constant 0 : index
    %215 = memref.load %arg9[%c0_62] : memref<1xf32, #tpu.memory_space<smem>>
    memref.store %214, %arg9[%c0_62] : memref<1xf32, #tpu.memory_space<smem>>
    return
  }
}

</mosaic_0001>

<bundles_post_ra>
// kernel: set_criterion_forward.2
= control target key start
LH: loop header
LB: loop body
LE: loop exit
PB: predicated region body
PF: predicated region fallthrough
CT: control target
= control target key end

     0   :  { %v615_v0 = vmov 0   ;;  %v616_v5 = vmov 0.0   ;;  %vm617_vm0 = vmmov 0   ;;  %vm85_vm1 = vcmask 1043456   ;;  %s777_s3 = inlined_call_operand.vmem [shape: f32[2,4,3,1], index: 3, kind: input, shape index: {}]   ;;  %s778_s0 = inlined_call_operand.vmem [shape: f32[2,4,8], index: 0, kind: input, shape index: {}]   ;;  %s779_s1 = inlined_call_operand.vmem [shape: f32[2,3,4], index: 1, kind: input, shape index: {}]   ;;  %s780_s2 = inlined_call_operand.vmem [shape: f32[2,4,1,8], index: 2, kind: input, shape index: {}]   ;;  %s781_s4 = inlined_call_operand.vmem [shape: f32[2,3,8], index: 4, kind: output, shape index: {}]  }
   0x1   :  { %590 = vset.pattern.permute.xlu1 %v615_v0  ;;  %589 = vset.pattern.permute.xlu0 %v615_v0  ;;  %v29_v1 = vld [vmem:[%s777_s3] sm:$0x7]  ;;  %v31_v2 = vld [vmem:[%s777_s3 + $0x8] sm:$0x7]  ;;  %v33_v3 = vld [vmem:[%s777_s3 + $0x10] sm:$0x7] }
   0x2   :  { %v357_v4 = vmul.f32 0.5, %v31_v2  ;;  %576 = vmatprep.subr.mxu0 %v616_v5  ;;  %581 = vmatprep.subr.mxu1 %v616_v5  ;;  %v35_v6 = vld [vmem:[%s777_s3 + $0x18] sm:$0x7]  ;;  %v17_v7 = vld [vmem:[%s778_s0] sm:$0xf]  ;;  %vm81_vm2 = vcmask 31744  }
   0x3   :  { %578 = vmatprep.mubr.msk.f32.mxu0 %vm617_vm0, %v616_v5  ;;  %583 = vmatprep.mubr.msk.f32.mxu1 %vm617_vm0, %v616_v5  ;;  %v358_v8 = vmul.f32 0.5, %v35_v6  ;;  %v566_v9 = vmul.f32 -1.442695, %v17_v7  ;;  %v18_v10 = vld [vmem:[%s778_s0 + $0x4] sm:$0xf]  ;;  %vm559_vm3 = vcmask 59392  }
   0x4   :  { %v365_v11 = vadd.f32 %v357_v4, %v29_v1  ;;  %v359_v12 = vsub.f32 %v29_v1, %v357_v4  ;;  %v567_v13 = vmul.f32 -1.442695, %v18_v10  ;;  %v32_v14 = vld [vmem:[%s777_s3 + $0xc] sm:$0x7]  ;;  %v30_v17 = vld [vmem:[%s777_s3 + $0x4] sm:$0x7]  ;;  %v237_v10 = vlaneseq }
   0x5   :  { %591 = vpow2.f32 %v566_v9  ;;  %v366_v15 = vadd.f32 %v358_v8, %v33_v3  ;;  %v360_v16 = vsub.f32 %v33_v3, %v358_v8  ;;  %v361_v18 = vmul.f32 0.5, %v32_v14  ;;  %v36_v19 = vld [vmem:[%s777_s3 + $0x1c] sm:$0x7]  ;;  %v34_v20 = vld [vmem:[%s777_s3 + $0x14] sm:$0x7] }
   0x6   :  { %395 = vperm.xlu0 %589, %v365_v11   ;;  %419 = vperm.xlu1 %590, %v359_v12   ;;  %593 = vpow2.f32 %v567_v13  ;;  %v362_v21 = vmul.f32 0.5, %v36_v19  ;;  %v375_v26 = vsub.f32 %v365_v11, %v359_v12  ;;  %v19_v5 = vld [vmem:[%s779_s1] sm:$0x7]  ;;  %v20_v7 = vld [vmem:[%s779_s1 + $0x4] sm:$0x7] }
   0x7   :  { %v367_v22 = vadd.f32 %v361_v18, %v30_v17  ;;  %v363_v24 = vsub.f32 %v30_v17, %v361_v18  ;;  %v376_v27 = vsub.f32 %v366_v15, %v360_v16  ;;  %v686_v11 = vld [vmem:[%s780_s2 + $0x2] sm:$0x1]  ;;  %v693_v13 = vld [vmem:[%s780_s2 + $0x3] sm:$0x1] }
   0x8   :  { %v368_v23 = vadd.f32 %v362_v21, %v34_v20  ;;  %v364_v25 = vsub.f32 %v34_v20, %v362_v21  ;;  %v345_v18 = vmul.f32 0.5, %v686_v11 }
   0x9   :  { %v377_v29 = vsub.f32 %v367_v22, %v363_v24 }
   0xa   :  { %400 = vperm.xlu0 %589, %v366_v15   ;;  %424 = vperm.xlu1 %590, %v360_v16   ;;  %v378_v28 = vsub.f32 %v368_v23, %v364_v25  ;;  %v703_v16 = vld [vmem:[%s780_s2 + $0x7] sm:$0x1] }
   0xb   :  { %v379_v32 = vmul.f32 %v377_v29, %v375_v26 }
   0xc   :  { %v380_v31 = vmul.f32 %v378_v28, %v376_v27 }
   0xe   :  { %447 = vperm.xlu0 %589, %v367_v22   ;;  %452 = vperm.xlu1 %590, %v368_v23   ;;  %v716_v22 = vld [vmem:[%s780_s2 + $0x1] sm:$0x1]  ;;  %v350_v23 = vmul.f32 0.5, %v703_v16 }
  0x12   :  { %v592_v30 = vpop.eup %591  ;;  %471 = vperm.xlu0 %589, %v363_v24   ;;  %476 = vperm.xlu1 %590, %v364_v25   ;;  %v722_v24 = vld [vmem:[%s780_s2 + $0x4] sm:$0x1]  ;;  %v727_v25 = vld [vmem:[%s780_s2 + $0x5] sm:$0x1] }
  0x13   :  { %v594_v33 = vpop.eup %593  ;;  %v43_v34 = vadd.f32 1.0, %v592_v30 }
  0x14   :  { %v44_v35 = vadd.f32 1.0, %v594_v33 }
  0x15   :  { %595 = vrcp.f32 %v43_v34 }
  0x16   :  { %597 = vrcp.f32 %v44_v35  ;;  %506 = vperm.xlu1 %590, %v380_v31   ;;  %501 = vperm.xlu0 %589, %v379_v32   ;;  %v356_v35 = vadd.f32 %v350_v23, %v727_v25 }
  0x1a   :  { %254 = vperm.xlu1 %590, %v33_v3   ;;  %249 = vperm.xlu0 %589, %v29_v1  }
  0x1e   :  { %280 = vperm.xlu1 %590, %v34_v20   ;;  %275 = vperm.xlu0 %589, %v30_v17   ;;  %v238_v17 = vshrl.u32 %v237_v10, 7  ;;  %v710_v20 = vld [vmem:[%s780_s2] sm:$0x1] }
  0x1f   :  { %v353_v28 = vadd.f32 %v345_v18, %v710_v20  ;;  %v347_v29 = vsub.f32 %v710_v20, %v345_v18 }
  0x20   :  { %v729_v26 = vsub.s32 0, %v238_v17 }
  0x22   :  { %v596_v36 = vpop.eup %595  ;;  %308 = vperm.xlu1 %590, %v35_v6   ;;  %303 = vperm.xlu0 %589, %v31_v2  }
  0x23   :  { %v598_v37 = vpop.eup %597  ;;  %v53_v38 = vsub.f32 1.0, %v596_v36  ;;  %v69_v39 = vadd.f32 1e-08, %v596_v36  ;;  %v49_v46 = vmul.f32 %v596_v36, %v596_v36  ;;  %v352_v36 = vsub.f32 %v727_v25, %v350_v23 }
  0x24   :  { %v54_v40 = vsub.f32 1.0, %v598_v37  ;;  %v70_v41 = vadd.f32 1e-08, %v598_v37  ;;  %v50_v48 = vmul.f32 %v598_v37, %v598_v37  ;;  %v386_v37 = vrot.slane %v353_v28, %v729_v26 }
  0x25   :  { %v55_v42 = vadd.f32 1e-08, %v53_v38  ;;  %599 = vlog2.f32 %v69_v39  ;;  %v65_v44 = vmul.f32 %v53_v38, %v53_v38  ;;  %v51_v56 = vmul.f32 0.75, %v49_v46 }
  0x26   :  { %v56_v43 = vadd.f32 1e-08, %v54_v40  ;;  %601 = vlog2.f32 %v70_v41  ;;  %336 = vperm.xlu1 %590, %v36_v19   ;;  %331 = vperm.xlu0 %589, %v32_v14   ;;  %v66_v45 = vmul.f32 %v54_v40, %v54_v40  ;;  %v52_v59 = vmul.f32 0.75, %v50_v48  ;;  %v698_v14 = vld [vmem:[%s780_s2 + $0x6] sm:$0x1] }
  0x27   :  { %603 = vlog2.f32 %v55_v42  ;;  %v67_v50 = vmul.f32 0.25, %v65_v44  ;;  %v349_v19 = vmul.f32 0.5, %v693_v13  ;;  %v346_v21 = vmul.f32 0.5, %v698_v14 }
  0x28   :  { %605 = vlog2.f32 %v56_v43  ;;  %v68_v53 = vmul.f32 0.25, %v66_v45  ;;  %v410_v38 = vrot.slane %v347_v29, %v729_v26  ;;  %v442_v43 = vrot.slane %v356_v35, %v729_v26 }
  0x29   :  { %v355_v30 = vadd.f32 %v349_v19, %v716_v22  ;;  %v351_v32 = vsub.f32 %v716_v22, %v349_v19  ;;  %v354_v33 = vadd.f32 %v346_v21, %v722_v24  ;;  %v348_v34 = vsub.f32 %v722_v24, %v346_v21 }
  0x2a   :  { %v466_v45 = vrot.slane %v352_v36, %v729_v26  ;;  %v372_v48 = vsub.f32 %v356_v35, %v352_v36 }
  0x2b   :  { %v438_v39 = vrot.slane %v355_v30, %v729_v26  ;;  %v462_v40 = vrot.slane %v351_v32, %v729_v26  ;;  %v390_v41 = vrot.slane %v354_v33, %v729_v26  ;;  %v414_v42 = vrot.slane %v348_v34, %v729_v26 }
  0x32   :  { %v600_v47 = vpop.eup %599 }
  0x33   :  { %v602_v49 = vpop.eup %601  ;;  %v72_v51 = vmul.f32 0.6931472, %v600_v47  ;;  %v370_v47 = vsub.f32 %v354_v33, %v348_v34 }
  0x34   :  { %v604_v52 = vpop.eup %603  ;;  %v74_v54 = vmul.f32 0.6931472, %v602_v49  ;;  %v369_v49 = vsub.f32 %v353_v28, %v347_v29 }
  0x35   :  { %v606_v55 = vpop.eup %605  ;;  %v58_v57 = vmul.f32 0.6931472, %v604_v52  ;;  %v75_v58 = vsub.f32 0.0, %v72_v51  ;;  %v374_v10 = vmul.f32 %v372_v48, %v370_v47 }
  0x36   :  { %v60_v60 = vmul.f32 0.6931472, %v606_v55  ;;  %v76_v61 = vsub.f32 0.0, %v74_v54 }
  0x37   :  { %v61_v62 = vsub.f32 0.0, %v58_v57  ;;  %v77_v63 = vmul.f32 %v75_v58, %v67_v50  ;;  %v371_v50 = vsub.f32 %v355_v30, %v351_v32 }
  0x38   :  { %v62_v0 = vsub.f32 0.0, %v60_v60  ;;  %v78_v1 = vmul.f32 %v76_v61, %v68_v53 }
  0x39   :  { %v63_v2 = vmul.f32 %v61_v62, %v51_v56 }
  0x3a   :  { %v64_v3 = vmul.f32 %v62_v0, %v52_v59 }
  0x3b   :  { %v79_v4 = vsub.f32 %v77_v63, %v63_v2 }
  0x3c   :  { %v80_v6 = vsub.f32 %v78_v1, %v64_v3 }
  0x3d   :  { %577 = vmatpush3.msk.msra.mxu0 %vm85_vm1, %v79_v4 }
  0x3e   :  { %582 = vmatpush3.msk.msra.mxu1 %vm85_vm1, %v80_v6  ;;  %579 = vmatmul.mubr.msk.f32.vlgmr.msra.gmra.mxu0 %vm81_vm2, %v19_v5  ;;  %v373_v5 = vmul.f32 %v371_v50, %v369_v49  ;;  %v240_v50 = vrot.slane %v710_v20, %v729_v26  ;;  %v298_v20 = vrot.slane %v698_v14, %v729_v26 }
  0x3f   :  { %584 = vmatmul.mubr.msk.f32.vlgmr.msra.gmra.mxu1 %vm81_vm2, %v20_v7 }
  0x81   :  { %v679_v8 = vpop.permute.xlu0 %395  ;;  %v681_v9 = vpop.permute.xlu1 %419 }
  0x82   :  { %v403_v51 = vmin.f32 %v386_v37, %v679_v8  ;;  %v427_v52 = vmax.f32 %v410_v38, %v681_v9  ;;  %v519_v59 = vmax.f32 %v386_v37, %v679_v8  ;;  %v521_v60 = vmin.f32 %v410_v38, %v681_v9 }
  0x83   :  { %v492_v9 = vrot.slane %v373_v5, %v729_v26 }
  0x84   :  { %v429_v3 = vsub.f32 %v403_v51, %v427_v52  ;;  %v523_v17 = vsub.f32 %v519_v59, %v521_v60  ;;  %v266_v51 = vrot.slane %v716_v22, %v729_v26  ;;  %v244_v52 = vrot.slane %v722_v24, %v729_v26 }
  0x85   :  { %v688_v12 = vpop.permute.xlu0 %400  ;;  %v425_v15 = vpop.permute.xlu1 %424  ;;  %v322_v24 = vrot.slane %v693_v13, %v729_v26 }
  0x86   :  { %v404_v55 = vmin.f32 %v390_v41, %v688_v12  ;;  %v428_v56 = vmax.f32 %v414_v42, %v425_v15  ;;  %v520_v63 = vmax.f32 %v390_v41, %v688_v12  ;;  %v522_v0 = vmin.f32 %v414_v42, %v425_v15 }
  0x87   :  { %v431_v8 = vmax.f32 %v429_v3, 0.0  ;;  %v496_v12 = vrot.slane %v374_v10, %v729_v26  ;;  %v525_v15 = vmax.f32 %v523_v17, 0.0 }
  0x88   :  { %v430_v6 = vsub.f32 %v404_v55, %v428_v56  ;;  %v524_v19 = vsub.f32 %v520_v63, %v522_v0 }
  0x89   :  { %v448_v27 = vpop.permute.xlu0 %447  ;;  %v453_v31 = vpop.permute.xlu1 %452 }
  0x8a   :  { %v455_v53 = vmin.f32 %v438_v39, %v448_v27  ;;  %v456_v57 = vmin.f32 %v442_v43, %v453_v31  ;;  %v527_v61 = vmax.f32 %v438_v39, %v448_v27  ;;  %v528_v1 = vmax.f32 %v442_v43, %v453_v31 }
  0x8b   :  { %v432_v27 = vmax.f32 %v430_v6, 0.0  ;;  %v526_v30 = vmax.f32 %v524_v19, 0.0 }
  0x8d   :  { %v472_v44 = vpop.permute.xlu0 %471  ;;  %v477_v46 = vpop.permute.xlu1 %476 }
  0x8e   :  { %v479_v54 = vmax.f32 %v462_v40, %v472_v44  ;;  %v480_v58 = vmax.f32 %v466_v45, %v477_v46  ;;  %v529_v62 = vmin.f32 %v462_v40, %v472_v44  ;;  %v530_v2 = vmin.f32 %v466_v45, %v477_v46 }
  0x90   :  { %v481_v4 = vsub.f32 %v455_v53, %v479_v54  ;;  %v482_v7 = vsub.f32 %v456_v57, %v480_v58  ;;  %v531_v18 = vsub.f32 %v527_v61, %v529_v62  ;;  %v532_v21 = vsub.f32 %v528_v1, %v530_v2 }
  0x91   :  { %v502_v32 = vpop.permute.xlu0 %501  ;;  %v507_v33 = vpop.permute.xlu1 %506  ;;  %v270_v53 = vrot.slane %v727_v25, %v729_v26  ;;  %v294_v58 = vrot.slane %v686_v11, %v729_v26  ;;  %v326_v2 = vrot.slane %v703_v16, %v729_v26 }
  0x92   :  { %v483_v23 = vmax.f32 %v481_v4, 0.0  ;;  %v484_v28 = vmax.f32 %v482_v7, 0.0  ;;  %v533_v29 = vmax.f32 %v531_v18, 0.0  ;;  %v534_v31 = vmax.f32 %v532_v21, 0.0 }
  0x93   :  { %v509_v35 = vadd.f32 %v502_v32, %v492_v9  ;;  %v510_v37 = vadd.f32 %v507_v33, %v496_v12 }
  0x94   :  { %v485_v34 = vmul.f32 %v483_v23, %v431_v8  ;;  %v486_v36 = vmul.f32 %v484_v28, %v432_v27  ;;  %v535_v38 = vmul.f32 %v533_v29, %v525_v15  ;;  %v536_v39 = vmul.f32 %v534_v31, %v526_v30 }
  0x95   :  { %v250_v42 = vpop.permute.xlu0 %249  ;;  %v255_v44 = vpop.permute.xlu1 %254 }
  0x96   :  { %v511_v40 = vsub.f32 %v509_v35, %v485_v34  ;;  %v512_v41 = vsub.f32 %v510_v37, %v486_v36  ;;  %v539_v43 = vadd.f32 1e-07, %v535_v38  ;;  %v540_v45 = vadd.f32 1e-07, %v536_v39 }
  0x97   :  { %v257_v55 = vsub.f32 %v240_v50, %v250_v42  ;;  %v258_v59 = vsub.f32 %v244_v52, %v255_v44 }
  0x98   :  { %v513_v46 = vadd.f32 1e-07, %v511_v40  ;;  %v514_v47 = vadd.f32 1e-07, %v512_v41  ;;  %607 = vrcp.f32 %v539_v43  ;;  %v537_v4 = vsub.f32 %v535_v38, %v511_v40 }
  0x99   :  { %609 = vrcp.f32 %v540_v45  ;;  %v276_v48 = vpop.permute.xlu0 %275  ;;  %v281_v49 = vpop.permute.xlu1 %280  ;;  %v259_v61 = vand.u32 2147483647, %v257_v55  ;;  %v260_v25 = vand.u32 2147483647, %v258_v59  ;;  %v538_v7 = vsub.f32 %v536_v39, %v512_v41 }
  0x9a   :  { %611 = vrcp.f32 %v513_v46  ;;  %v283_v56 = vsub.f32 %v266_v51, %v276_v48  ;;  %v284_v60 = vsub.f32 %v270_v53, %v281_v49 }
  0x9b   :  { %613 = vrcp.f32 %v514_v47 }
  0x9c   :  { %v285_v22 = vand.u32 2147483647, %v283_v56  ;;  %v286_v0 = vand.u32 2147483647, %v284_v60 }
  0x9d   :  { %v304_v54 = vpop.permute.xlu0 %303  ;;  %v309_v57 = vpop.permute.xlu1 %308 }
  0x9e   :  { %v311_v62 = vsub.f32 %v294_v58, %v304_v54  ;;  %v312_v1 = vsub.f32 %v298_v20, %v309_v57  ;;  %v287_v10 = vadd.f32 %v285_v22, %v259_v61  ;;  %v288_v19 = vadd.f32 %v286_v0, %v260_v25 }
  0xa0   :  { %v313_v17 = vand.u32 2147483647, %v311_v62  ;;  %v314_v21 = vand.u32 2147483647, %v312_v1 }
  0xa1   :  { %v332_v3 = vpop.permute.xlu0 %331  ;;  %v337_v5 = vpop.permute.xlu1 %336 }
  0xa2   :  { %v339_v18 = vsub.f32 %v322_v24, %v332_v3  ;;  %v340_v13 = vsub.f32 %v326_v2, %v337_v5  ;;  %v315_v28 = vadd.f32 %v313_v17, %v287_v10  ;;  %v316_v16 = vadd.f32 %v314_v21, %v288_v19 }
  0xa4   :  { %v341_v12 = vand.u32 2147483647, %v339_v18  ;;  %v342_v26 = vand.u32 2147483647, %v340_v13 }
  0xa5   :  { %v608_v63 = vpop.eup %607 }
  0xa6   :  { %v610_v11 = vpop.eup %609  ;;  %v542_v23 = vmul.f32 %v608_v63, %v537_v4  ;;  %v343_v30 = vadd.f32 %v341_v12, %v315_v28  ;;  %v344_v31 = vadd.f32 %v342_v26, %v316_v16 }
  0xa7   :  { %v612_v6 = vpop.eup %611  ;;  %v544_v27 = vmul.f32 %v610_v11, %v538_v7 }
  0xa8   :  { %v614_v14 = vpop.eup %613  ;;  %v516_v8 = vmul.f32 %v612_v6, %v485_v34  ;;  %v547_v37 = vmul.f32 5.0, %v343_v30  ;;  %v548_v40 = vmul.f32 5.0, %v344_v31 }
  0xa9   :  { %v518_v9 = vmul.f32 %v614_v14, %v486_v36 }
  0xaa   :  { %v545_v15 = vsub.f32 %v516_v8, %v542_v23 }
  0xab   :  { %v546_v29 = vsub.f32 %v518_v9, %v544_v27 }
  0xac   :  { %v553_v32 = vsub.f32 0.0, %v545_v15 }
  0xad   :  { %v554_v35 = vsub.f32 0.0, %v546_v29 }
  0xae   :  { %v555_v36 = vmul.f32 2.0, %v553_v32 }
  0xaf   :  { %v556_v45 = vmul.f32 2.0, %v554_v35 }
  0xfe   :  { %v155_v33 = vpop.f32.mrf.mxu0 }
  0xff   :  { %v549_v38 = vmul.f32 2.0, %v155_v33  ;;  %v231_v39 = vpop.f32.mrf.mxu1 }
 0x100   :  { %v550_v41 = vmul.f32 2.0, %v231_v39  ;;  %v580_v34 = vpop.f32.mrf.mxu0 }
 0x101   :  { %v551_v42 = vadd.f32 %v549_v38, %v547_v37  ;;  %v585_v43 = vpop.f32.mrf.mxu1 }
 0x102   :  { %v552_v44 = vadd.f32 %v550_v41, %v548_v40 }
 0x103   :  { %v557_v46 = vadd.f32 %v555_v36, %v551_v42 }
 0x104   :  { %v558_v47 = vadd.f32 %v556_v45, %v552_v44 }
 0x105   :  { %560 = vst.msk [vmem:[%s781_s4] sm:$0x7] %vm559_vm3, %v557_v46 }
 0x106   :  { %561 = vst.msk [vmem:[%s781_s4 + $0x4] sm:$0x7] %vm559_vm3, %v558_v47 }

// kernel: set_criterion_forward.3
= control target key start
LH: loop header
LB: loop body
LE: loop exit
PB: predicated region body
PF: predicated region fallthrough
CT: control target
= control target key end

     0   :  { %17 = vsyncpa [#allocation4], 0  ;;  %s1350_s0 = inlined_call_operand.vmem [shape: f32[2,8,4], index: 0, kind: input, shape index: {}]   ;;  %s1351_s1 = inlined_call_operand.vmem [shape: f32[2,3,8], index: 1, kind: input, shape index: {}]   ;;  %s1352_s2 = inlined_call_operand.vmem [shape: f32[2,3,4], index: 2, kind: input, shape index: {}]   ;;  %s1353_s3 = inlined_call_operand.vmem [shape: f32[2,4,8], index: 3, kind: input, shape index: {}]   ;;  %s1354_s4 = inlined_call_operand.vmem [shape: f32[2,4,3], index: 4, kind: input, shape index: {}]   ;;  %s1355_s5 = inlined_call_operand.<no memory space> [shape: f32[1], index: 5, kind: input, shape index: {}]   ;;  %s1356_s6 = inlined_call_operand.hbm [shape: f32[1], index: 6, kind: output, shape index: {0}]   ;;  %s1357_s7 = inlined_call_operand.hbm [shape: f32[1], index: 7, kind: output, shape index: {1}]   ;;  %s1358_s8 = inlined_call_operand.hbm [shape: f32[1], index: 8, kind: output, shape index: {2}]   ;;  %s1359_s9 = inlined_call_operand.hbm [shape: f32[1], index: 9, kind: output, shape index: {3}]   ;;  %s1360_s10 = inlined_call_operand.hbm [shape: f32[1], index: 10, kind: output, shape index: {4}]  }
   0x1   :  { %18 = vsyncpa [#allocation6], 0  ;;  %v1061_v0 = vld [vmem:[%s1350_s0] sm:$0xff]  ;;  %v1066_v1 = vld [vmem:[%s1350_s0 + $0x8] sm:$0xff]  ;;  %v1361_v2 = vmov 0.0   ;;  %vm104_vm0 = vcmask 64512  }
   0x2   :  { %859 = vmatprep.subr.mxu0 %v1361_v2  ;;  %864 = vmatprep.subr.mxu1 %v1361_v2  ;;  %v34_v3 = vld [vmem:[%s1351_s1] sm:$0x7]  ;;  %vm996_vm1 = vmmov 0   ;;  %v35_v4 = vld [vmem:[%s1351_s1 + $0x4] sm:$0x7] }
   0x3   :  { %860 = vmatpush3.msra.mxu0 %v1061_v0  ;;  %861 = vmatprep.mubr.msk.f32.mxu0 %vm996_vm1, %v1361_v2 }
   0x4   :  { %19 = vsyncpa [#allocation9], 0  ;;  %865 = vmatpush3.msra.mxu1 %v1066_v1  ;;  %866 = vmatprep.mubr.msk.f32.mxu1 %vm996_vm1, %v1361_v2  ;;  %vm335_vm2 = vcmask 23552   ;;  %v1365_v7 = vlaneseq  ;;  %v1093_v8 = vld [vmem:[%s1352_s2] sm:$0x7]  ;;  %vm315_vm4 = vcmask 26624  }
   0x5   :  { %862 = vmatmul.mubr.msk.f32.vlgmr.msra.gmra.mxu0 %vm104_vm0, %v34_v3  ;;  %867 = vmatmul.mubr.msk.f32.vlgmr.msra.gmra.mxu1 %vm104_vm0, %v35_v4  ;;  %v336_v5 = vsel %vm335_vm2, %v1061_v0, -inf  ;;  %v339_v6 = vsel %vm335_vm2, %v1066_v1, -inf  ;;  %vm720_vm3 = vcmp.gt.f32.partialorder %v1093_v8, 0.5  ;;  %v997_v20 = vmov 3   ;;  %v39_v21 = vld [vmem:[%s1353_s3 + $0x4] sm:$0xf] }
   0x6   :  { %874 = vmatprep.subr.mxu1 %v1361_v2  ;;  %869 = vmatprep.subr.mxu0 %v1361_v2  ;;  %v1096_v9 = vand.u32 127, %v1365_v7  ;;  %v38_v22 = vld [vmem:[%s1353_s3] sm:$0xf]  ;;  %v1120_v23 = vld [vmem:[%s1352_s2 + $0x4] sm:$0x7]  ;;  %vm541_vm14 = vcmask 19456  }
   0x7   :  { %875 = vmatpush3.xpose.msk.msra.mxu1 %vm104_vm0, %v35_v4  ;;  %870 = vmatpush3.xpose.msk.msra.mxu0 %vm104_vm0, %v34_v3  ;;  %vm721_vm5 = vcmp.gt.f32.partialorder %v1120_v23, 0.5  ;;  %v55_v51 = vand.u32 2147483647, %v1061_v0  ;;  %v56_v59 = vand.u32 2147483647, %v1066_v1  ;;  %s998_s14 = smov [#allocation3]  }
   0x8   :  { %876 = vmatprep.mubr.msk.f32.mxu1 %vm996_vm1, %v1361_v2  ;;  %871 = vmatprep.mubr.msk.f32.mxu0 %vm996_vm1, %v1361_v2  ;;  %v722_v10 = vsel %vm720_vm3, %v1096_v9, 4  ;;  %v723_v26 = vsel %vm721_vm5, %v1096_v9, 4  ;;  %v836_v3 = vmul.f32 -1.442695, %v1061_v0  ;;  %vm366_vm3 = vcmask 1041409   ;;  %s999_s1 = smov [#allocation5]  }
   0x9   :  { %337 = vmax.xlane.f32.xlu1 %v336_v5  ;;  %v724_v13 = vsel %vm315_vm4, %v722_v10, 2147483647  ;;  %901 = vset.pattern.permute.xlu0 %v997_v20  ;;  %v1132_v30 = vsel %vm315_vm4, %v723_v26, 2147483647  ;;  %v57_v58 = vsub.f32 0.0, %v55_v51  ;;  %v58_v63 = vsub.f32 0.0, %v56_v59 }
   0xa   :  { %v726_v17 = vshra.s32 %v724_v13, 16  ;;  %877 = vmatmul.mubr.msk.f32.vlgmr.msra.gmra.mxu1 %vm104_vm0, %v39_v21  ;;  %872 = vmatmul.mubr.msk.f32.vlgmr.msra.gmra.mxu0 %vm104_vm0, %v38_v22  ;;  %v741_v35 = vshra.s32 %v1132_v30, 16  ;;  %v725_v36 = vand.u32 65535, %v724_v13  ;;  %v837_v5 = vmul.f32 -1.442695, %v1066_v1  ;;  %s1000_s25 = smov [#allocation7]  }
   0xb   :  { %v59_v62 = vmul.f32 1.442695, %v57_v58  ;;  %v61_v4 = vmul.f32 1.442695, %v58_v63  ;;  %vm91_vm5 = vcmask 31744   ;;  %s1001_s27 = smov [#allocation8]  }
   0xc   :  { %v728_v19 = vcvt.s32.f32 %v726_v17  ;;  %v1148_v40 = vcvt.s32.f32 %v741_v35  ;;  %v727_v41 = vcvt.s32.f32 %v725_v36  ;;  %s1002_s29 = smov [#allocation10]  }
   0xd   :  { %340 = vmax.xlane.f32.xlu1 %v339_v6 }
  0x92   :  { %v338_v39 = vpop.xlane.xlu1 %337 }
  0x93   :  { %vm342_vm9 = vcmp.ge.f32.partialorder %v338_v39, %v1061_v0 }
  0x94   :  { %v842_v44 = vsel %vm342_vm9, 1.0, %v1361_v2  ;;  %vm375_vm9 = vcmask 1024  }
  0x96   :  { %v341_v43 = vpop.xlane.xlu1 %340 }
  0x97   :  { %vm343_vm10 = vcmp.ge.f32.partialorder %v341_v43, %v1066_v1 }
  0x98   :  { %v843_v45 = vsel %vm343_vm10, 1.0, %v1361_v2  ;;  %vm663_vm10 = vcmask 17408  }
  0x99   :  { %v902_v46 = vpack.i.bf16 %v843_v45, %v842_v44 }
  0xc5   :  { %v1100_v11 = vpop.f32.mrf.mxu0  ;;  %v1102_v12 = vpop.f32.mrf.mxu1 }
  0xc6   :  { %v680_v14 = vsel %vm315_vm4, %v1100_v11, -inf  ;;  %v683_v18 = vsel %vm315_vm4, %v1102_v12, -inf  ;;  %v263_v47 = vand.u32 2147483647, %v1100_v11  ;;  %v264_v48 = vand.u32 2147483647, %v1102_v12 }
  0xc7   :  { %v863_v15 = vpop.f32.mrf.mxu0  ;;  %v868_v16 = vpop.f32.mrf.mxu1  ;;  %681 = vmax.xlane.f32.xlu0 %v680_v14  ;;  %v840_v52 = vmul.f32 -1.442695, %v1100_v11  ;;  %v841_v56 = vmul.f32 -1.442695, %v1102_v12  ;;  %v1363_v20 = vmax.f32 %v1102_v12, 0.0 }
  0xc8   :  { %v265_v53 = vsub.f32 0.0, %v263_v47  ;;  %v266_v57 = vsub.f32 0.0, %v264_v48  ;;  %v1364_v16 = vmax.f32 %v1100_v11, 0.0  ;;  %v1206_v47 = vld [vmem:[%s1354_s4] sm:$0xf] }
  0xc9   :  { %907 = vpow2.f32 %v840_v52  ;;  %v1195_v36 = vsub.f32 %v1363_v20, %v1102_v12  ;;  %v572_v52 = vmul.f32 0.5, %v1206_v47 }
  0xca   :  { %v1158_v49 = vpop.f32.mrf.mxu1  ;;  %v1160_v50 = vpop.f32.mrf.mxu0  ;;  %v267_v60 = vmul.f32 1.442695, %v265_v53  ;;  %909 = vpow2.f32 %v841_v56  ;;  %v269_v61 = vmul.f32 1.442695, %v266_v57 }
  0xcb   :  { %684 = vmax.xlane.f32.xlu0 %v683_v18  ;;  %v561_v10 = vmul.f32 0.5, %v1158_v49  ;;  %v560_v15 = vmul.f32 0.5, %v1160_v50  ;;  %v576_v59 = vrot.slane %v572_v52, 2 }
  0xcc   :  { %v878_v54 = vpop.f32.mrf.mxu1  ;;  %v873_v55 = vpop.f32.mrf.mxu0  ;;  %911 = vpow2.f32 %v267_v60 }
  0xcd   :  { %913 = vpow2.f32 %v269_v61  ;;  %v564_v22 = vrot.slane %v560_v15, 2 }
  0xce   :  { %915 = vpow2.f32 %v59_v62 }
  0xcf   :  { %729 = vmin.xlane.f32.xlu0 %v728_v19  ;;  %917 = vpow2.f32 %v836_v3  ;;  %v568_v45 = vsub.f32 %v1160_v50, %v564_v22 }
  0xd0   :  { %919 = vpow2.f32 %v61_v4  ;;  %v580_v4 = vsub.f32 %v1206_v47, %v576_v59 }
  0xd1   :  { %921 = vpow2.f32 %v837_v5  ;;  %v582_v5 = vadd.f32 %v576_v59, %v1206_v47 }
  0xd6   :  { %v908_v6 = vpop.eup %907 }
  0xd7   :  { %v910_v13 = vpop.eup %909  ;;  %v257_v14 = vadd.f32 1.0, %v908_v6 }
  0xd8   :  { %v258_v18 = vadd.f32 1.0, %v910_v13 }
  0xd9   :  { %v1171_v17 = vpop.eup %911  ;;  %923 = vrcp.f32 %v257_v14 }
  0xda   :  { %v1174_v21 = vpop.eup %913  ;;  %v271_v26 = vadd.f32 1.0, %v1171_v17  ;;  %925 = vrcp.f32 %v258_v18  ;;  %v277_v51 = vand.u32 2147483647, %v1171_v17 }
  0xdb   :  { %v280_v39 = vadd.f32 1.0, %v1174_v21  ;;  %v286_v56 = vand.u32 2147483647, %v1174_v21 }
  0xdc   :  { %927 = vlog2.f32 %v271_v26  ;;  %vm1221_vm11 = vcmp.lt.f32.partialorder %v277_v51, 0.0004427343 }
  0xdd   :  { %929 = vlog2.f32 %v280_v39  ;;  %vm1228_vm12 = vcmp.lt.f32.partialorder %v286_v56, 0.0004427343 }
 0x150   :  { %v682_v24 = vpop.xlane.xlu0 %681 }
 0x151   :  { %vm686_vm6 = vcmp.eq.f32.partialorder %v1100_v11, %v682_v24  ;;  %v1176_v24 = vpop.eup %915 }
 0x152   :  { %v688_v25 = vsel %vm686_vm6, %v1096_v9, 4  ;;  %v918_v35 = vpop.eup %917  ;;  %v63_v43 = vadd.f32 1.0, %v1176_v24  ;;  %vm369_vm6 = vcmask 58368  }
 0x153   :  { %v1127_v27 = vsel %vm315_vm4, %v688_v25, 2147483647  ;;  %v1181_v25 = vsub.f32 %v1364_v16, %v1100_v11  ;;  %v1208_v48 = vpop.eup %919  ;;  %v49_v54 = vadd.f32 1.0, %v918_v35 }
 0x154   :  { %v685_v28 = vpop.xlane.xlu0 %684  ;;  %v692_v29 = vshra.s32 %v1127_v27, 16  ;;  %v922_v58 = vpop.eup %921  ;;  %931 = vlog2.f32 %v63_v43  ;;  %v72_v62 = vadd.f32 1.0, %v1208_v48 }
 0x155   :  { %vm687_vm7 = vcmp.eq.f32.partialorder %v1102_v12, %v685_v28  ;;  %v274_v28 = vmul.f32 -0.5, %v1171_v17  ;;  %v50_v13 = vadd.f32 1.0, %v922_v58  ;;  %933 = vrcp.f32 %v49_v54 }
 0x156   :  { %v689_v31 = vsel %vm687_vm7, %v1096_v9, 4  ;;  %v1135_v32 = vcvt.s32.f32 %v692_v29  ;;  %935 = vlog2.f32 %v72_v62  ;;  %v632_v54 = vmin.f32 %v568_v45, %v580_v4 }
 0x157   :  { %v1138_v33 = vsel %vm315_vm4, %v689_v31, 2147483647  ;;  %v275_v55 = vadd.f32 1.0, %v274_v28  ;;  %937 = vrcp.f32 %v50_v13  ;;  %vm760_vm7 = vcmask 2048  }
 0x158   :  { %695 = vmin.xlane.f32.xlu0 %v1135_v32  ;;  %v707_v34 = vshra.s32 %v1138_v33, 16  ;;  %v1145_v38 = vpop.xlane.xlu0 %729 }
 0x159   :  { %vm731_vm8 = vcmp.eq.f32.partialorder %v728_v19, %v1145_v38  ;;  %v565_v19 = vrot.slane %v561_v10, 2  ;;  %v1219_v14 = vmul.f32 %v1171_v17, %v275_v55 }
 0x15a   :  { %v1143_v37 = vcvt.s32.f32 %v707_v34  ;;  %v732_v42 = vsel %vm731_vm8, %v727_v41, inf  ;;  %v1190_v34 = vld [vmem:[%s1354_s4 + $0x4] sm:$0xf]  ;;  %v283_v41 = vmul.f32 -0.5, %v1174_v21 }
 0x15b   :  { %v569_v29 = vsub.f32 %v1158_v49, %v565_v19  ;;  %v571_v31 = vadd.f32 %v565_v19, %v1158_v49 }
 0x15c   :  { %710 = vmin.xlane.f32.xlu1 %v1143_v37  ;;  %v284_v63 = vadd.f32 1.0, %v283_v41  ;;  %v924_v41 = vpop.eup %923 }
 0x15d   :  { %v585_v44 = vsub.f32 %v571_v31, %v569_v29  ;;  %v926_v17 = vpop.eup %925 }
 0x15f   :  { %v589_v3 = vrot.slane %v585_v44, 1 }
 0x160   :  { %744 = vmin.xlane.f32.xlu1 %v1148_v40 }
 0x161   :  { %v593_v28 = vmul.f32 %v589_v3, %v585_v44 }
 0x164   :  { %733 = vmin.xlane.f32.xlu1 %v732_v42  ;;  %v573_v42 = vmul.f32 0.5, %v1190_v34 }
 0x166   :  { %v577_v53 = vrot.slane %v573_v42, 2  ;;  %v594_v42 = vsub.f32 %v582_v5, %v580_v4 }
 0x168   :  { %v581_v60 = vsub.f32 %v1190_v34, %v577_v53  ;;  %v583_v61 = vadd.f32 %v577_v53, %v1190_v34  ;;  %v598_v55 = vrot.slane %v594_v42, 1 }
 0x16a   :  { %v605_v6 = vmin.f32 %v571_v31, %v583_v61  ;;  %v607_v10 = vmax.f32 %v569_v29, %v581_v60  ;;  %v595_v18 = vsub.f32 %v583_v61, %v581_v60  ;;  %v631_v35 = vmax.f32 %v571_v31, %v583_v61 }
 0x16b   :  { %v633_v39 = vmin.f32 %v569_v29, %v581_v60  ;;  %v291_v29 = vsub.f32 1.0, %v924_v41  ;;  %v602_v60 = vmul.f32 %v598_v55, %v594_v42  ;;  %v740_v55 = vand.u32 65535, %v1132_v30 }
 0x16c   :  { %v609_v26 = vsub.f32 %v605_v6, %v607_v10  ;;  %v599_v43 = vrot.slane %v595_v18, 1  ;;  %v303_v10 = vmul.f32 %v924_v41, %v924_v41  ;;  %v538_v30 = vsub.f32 %v1158_v49, %v1190_v34 }
 0x16d   :  { %v635_v2 = vsub.f32 %v631_v35, %v633_v39  ;;  %v1372_v49 = vlaneseq }
 0x16e   :  { %903 = vperm.xlu0 %901, %v902_v46   ;;  %v570_v46 = vadd.f32 %v564_v22, %v1160_v50  ;;  %v606_v22 = vmax.f32 %v568_v45, %v580_v4  ;;  %v611_v53 = vmax.f32 %v609_v26, 0.0  ;;  %v603_v20 = vmul.f32 %v599_v43, %v595_v18 }
 0x16f   :  { %v637_v44 = vmax.f32 %v635_v2, 0.0  ;;  %v304_v18 = vmul.f32 %v926_v17, %v926_v17  ;;  %v742_v4 = vcvt.s32.f32 %v740_v55  ;;  %v359_v34 = vshrl.u32 %v1372_v49, 7 }
 0x170   :  { %v584_v57 = vsub.f32 %v570_v46, %v568_v45  ;;  %v604_v19 = vmin.f32 %v570_v46, %v582_v5  ;;  %v630_v58 = vmax.f32 %v570_v46, %v582_v5  ;;  %v615_v7 = vrot.slane %v611_v53, 1  ;;  %v928_v45 = vpop.eup %927 }
 0x171   :  { %v621_v46 = vadd.f32 %v603_v20, %v593_v28  ;;  %v292_v5 = vsub.f32 1.0, %v926_v17  ;;  %v641_v6 = vrot.slane %v637_v44, 1  ;;  %v66_v20 = vmul.f32 -0.5, %v1176_v24 }
 0x172   :  { %v588_v15 = vrot.slane %v584_v57, 1  ;;  %v608_v52 = vsub.f32 %v604_v19, %v606_v22  ;;  %v634_v31 = vsub.f32 %v630_v58, %v632_v54  ;;  %v1225_v3 = vmul.f32 %v615_v7, %v611_v53  ;;  %v930_v7 = vpop.eup %929 }
 0x173   :  { %v932_v56 = vpop.eup %931  ;;  %v293_v22 = vmul.f32 %v291_v29, %v291_v29  ;;  %v75_v28 = vmul.f32 -0.5, %v1208_v48  ;;  %v294_v35 = vmul.f32 %v292_v5, %v292_v5  ;;  %v282_v43 = vmul.f32 0.6931472, %v930_v7 }
 0x174   :  { %v592_v59 = vmul.f32 %v588_v15, %v584_v57  ;;  %v610_v16 = vmax.f32 %v608_v52, 0.0  ;;  %v285_v57 = vmul.f32 %v1174_v21, %v284_v63  ;;  %v636_v51 = vmax.f32 %v634_v31, 0.0  ;;  %v934_v42 = vpop.eup %933 }
 0x175   :  { %v1235_v2 = vsub.f32 %v621_v46, %v1225_v3  ;;  %v1238_v21 = vmul.f32 %v641_v6, %v637_v44  ;;  %v273_v63 = vmul.f32 0.6931472, %v928_v45  ;;  %v1248_v52 = vmul.f32 0.75, %v303_v10  ;;  %v936_v17 = vpop.eup %935 }
 0x176   :  { %v614_v61 = vrot.slane %v610_v16, 1  ;;  %v620_v15 = vadd.f32 %v602_v60, %v592_v59  ;;  %v640_v19 = vrot.slane %v636_v51, 1  ;;  %v67_v59 = vadd.f32 1.0, %v66_v20  ;;  %v938_v10 = vpop.eup %937 }
 0x177   :  { %v649_v41 = vadd.f32 1e-07, %v1238_v21  ;;  %v1251_v58 = vmul.f32 0.75, %v304_v18  ;;  %v69_v29 = vand.u32 2147483647, %v1176_v24  ;;  %v279_v31 = vsel %vm1221_vm11, %v1219_v14, %v273_v63 }
 0x178   :  { %v1232_v13 = vmul.f32 %v614_v61, %v610_v16  ;;  %v625_v16 = vadd.f32 1e-07, %v1235_v2  ;;  %v1245_v39 = vmul.f32 %v640_v19, %v636_v51  ;;  %v76_v44 = vadd.f32 1.0, %v75_v28 }
 0x179   :  { %v295_v60 = vmul.f32 0.25, %v293_v22  ;;  %v296_v61 = vmul.f32 0.25, %v294_v35  ;;  %v78_v46 = vand.u32 2147483647, %v1208_v48  ;;  %v288_v45 = vsel %vm1228_vm12, %v285_v57, %v282_v43 }
 0x17a   :  { %v1241_v26 = vsub.f32 %v620_v15, %v1232_v13  ;;  %939 = vrcp.f32 %v625_v16  ;;  %v648_v54 = vadd.f32 1e-07, %v1245_v39  ;;  %v537_v5 = vsub.f32 %v1160_v50, %v1206_v47 }
 0x17b   :  { %941 = vrcp.f32 %v649_v41  ;;  %v691_v51 = vand.u32 65535, %v1127_v27  ;;  %v65_v62 = vmul.f32 0.6931472, %v932_v56  ;;  %v68_v14 = vmul.f32 %v1176_v24, %v67_v59 }
 0x17c   :  { %v624_v53 = vadd.f32 1e-07, %v1241_v26  ;;  %v299_v6 = vadd.f32 %v1181_v25, %v279_v31  ;;  %vm1273_vm13 = vcmp.lt.f32.partialorder %v69_v29, 0.0004427343  ;;  %v539_v50 = vand.u32 2147483647, %v537_v5 }
 0x17d   :  { %v540_v47 = vand.u32 2147483647, %v538_v30  ;;  %v74_v27 = vmul.f32 0.6931472, %v936_v17  ;;  %v77_v20 = vmul.f32 %v1208_v48, %v76_v44  ;;  %vm1279_vm15 = vcmp.lt.f32.partialorder %v78_v46, 0.0004427343 }
 0x17e   :  { %943 = vrcp.f32 %v624_v53  ;;  %v81_v25 = vmax.f32 %v1061_v0, 0.0  ;;  %v542_v18 = vsel %vm541_vm14, %v539_v50, 0.0  ;;  %v71_v56 = vsel %vm1273_vm13, %v68_v14, %v65_v62 }
 0x17f   :  { %945 = vrcp.f32 %v648_v54  ;;  %v543_v19 = vsel %vm541_vm14, %v540_v47, 0.0  ;;  %v83_v63 = vmul.f32 %v934_v42, %v934_v42  ;;  %v1375_v22 = vmax.f32 %v1100_v11, 0.0 }
 0x180   :  { %v1288_v28 = vadd.f32 %v543_v19, %v542_v18  ;;  %v82_v41 = vmax.f32 %v1066_v1, 0.0  ;;  %v84_v43 = vmul.f32 %v938_v10, %v938_v10  ;;  %v300_v53 = vadd.f32 %v1195_v36, %v288_v45 }
 0x181   :  { %v307_v16 = vadd.f32 %v1375_v22, %v279_v31  ;;  %v1376_v0 = vmax.f32 %v1102_v12, 0.0  ;;  %v693_v42 = vcvt.s32.f32 %v691_v51  ;;  %v706_v11 = vand.u32 65535, %v1138_v33 }
 0x182   :  { %v80_v54 = vsel %vm1279_vm15, %v77_v20, %v74_v27  ;;  %v360_v55 = vsub.s32 %v1096_v9, %v359_v34  ;;  %v87_v29 = vadd.f32 %v81_v25, %v71_v56  ;;  %v647_v1 = vsub.f32 %v1238_v21, %v1235_v2 }
 0x183   :  { %v308_v59 = vadd.f32 %v1376_v0, %v288_v45  ;;  %v86_v33 = vmul.f32 0.75, %v84_v43  ;;  %v88_v46 = vadd.f32 %v82_v41, %v80_v54  ;;  %v646_v9 = vsub.f32 %v1245_v39, %v1241_v26 }
 0x184   :  { %v301_v30 = vmul.f32 %v299_v6, %v295_v60  ;;  %v302_v51 = vmul.f32 %v300_v53, %v296_v61  ;;  %v309_v2 = vmul.f32 %v307_v16, %v1248_v52  ;;  %v708_v39 = vcvt.s32.f32 %v706_v11 }
 0x185   :  { %v90_v61 = vmul.f32 %v88_v46, %v86_v33 }
 0x186   :  { %v311_v47 = vsub.f32 %v301_v30, %v309_v2 }
 0x187   :  { %v940_v36 = vpop.eup %939  ;;  %v93_v27 = vsel %vm91_vm5, %v90_v61, 0.0 }
 0x188   :  { %v942_v44 = vpop.eup %941  ;;  %v629_v45 = vmul.f32 %v940_v36, %v1225_v3  ;;  %v313_v25 = vmul.f32 %v311_v47, %v1093_v8 }
 0x189   :  { %v653_v21 = vmul.f32 %v942_v44, %v647_v1 }
 0x18a   :  { %v316_v56 = vsel %vm315_vm4, %v313_v25, 0.0 }
 0x18b   :  { %v944_v5 = vpop.eup %943  ;;  %v655_v26 = vsub.f32 %v629_v45, %v653_v21 }
 0x18c   :  { %v946_v62 = vpop.eup %945  ;;  %v627_v10 = vmul.f32 %v944_v5, %v1232_v13 }
 0x18d   :  { %v651_v57 = vmul.f32 %v946_v62, %v646_v9  ;;  %v657_v6 = vsub.f32 1.0, %v655_v26  ;;  %v329_v9 = vstv %s1355_s5 }
 0x18e   :  { %947 = vrcp.f32 %v329_v9 }
 0x18f   :  { %v654_v52 = vsub.f32 %v627_v10, %v651_v57 }
 0x191   :  { %v656_v13 = vsub.f32 1.0, %v654_v52 }
 0x19b   :  { %v948_v52 = vpop.eup %947 }
 0x1e1   :  { %v1269_v15 = vpop.xlane.xlu0 %695 }
 0x1e2   :  { %vm697_vm1 = vcmp.eq.f32.partialorder %v1135_v32, %v1269_v15  ;;  %v310_v32 = vmul.f32 %v308_v59, %v1251_v58  ;;  %v660_v58 = vrot.slane %v657_v6, 7  ;;  %v702_v43 = vcvt.f32.s32 %v1269_v15 }
 0x1e3   :  { %v698_v14 = vsel %vm697_vm1, %v693_v42, inf }
 0x1e4   :  { %v312_v49 = vsub.f32 %v302_v51, %v310_v32  ;;  %v661_v20 = vsel %vm366_vm3, %v660_v58, %v656_v13  ;;  %v703_v59 = vshll.u32 %v702_v43, 16 }
 0x1e5   :  { %v1271_v7 = vpop.xlane.xlu1 %710  ;;  %v664_v57 = vsel %vm663_vm10, %v661_v20, 0.0 }
 0x1e6   :  { %vm712_vm2 = vcmp.eq.f32.partialorder %v1143_v37, %v1271_v7  ;;  %v314_v18 = vmul.f32 %v312_v49, %v1120_v23  ;;  %v717_v23 = vcvt.f32.s32 %v1271_v7 }
 0x1e7   :  { %v713_v50 = vsel %vm712_vm2, %v708_v39, inf }
 0x1e8   :  { %v718_v1 = vshll.u32 %v717_v23, 16 }
 0x1e9   :  { %v1290_v35 = vpop.xlane.xlu1 %744  ;;  %v904_v48 = vpop.permute.xlu0 %903 }
 0x1ea   :  { %vm746_vm0 = vcmp.eq.f32.partialorder %v1148_v40, %v1290_v35  ;;  %v906_v12 = vunpack.i.h.bf16 %v904_v48  ;;  %v905_v31 = vunpack.i.l.bf16 %v904_v48  ;;  %v85_v40 = vmul.f32 0.75, %v83_v63 }
 0x1eb   :  { %v747_v17 = vsel %vm746_vm0, %v742_v4, inf  ;;  %v317_v63 = vsel %vm315_vm4, %v314_v18, 0.0  ;;  %v736_v48 = vcvt.f32.s32 %v1145_v38  ;;  %v751_v42 = vcvt.f32.s32 %v1290_v35 }
 0x1ec   :  { %748 = vmin.xlane.f32.xlu1 %v747_v17  ;;  %v365_v4 = vrot.slane %v906_v12, %v360_v55  ;;  %v361_v3 = vrot.slane %v905_v31, %v360_v55  ;;  %v89_v60 = vmul.f32 %v87_v29, %v85_v40  ;;  %v318_v22 = vadd.f32 %v317_v63, %v316_v56 }
 0x1ed   :  { %v734_v16 = vpop.xlane.xlu1 %733  ;;  %v737_v0 = vshll.u32 %v736_v48, 16  ;;  %v752_v36 = vshll.u32 %v751_v42, 16  ;;  %v1377_v40 = vmov 0.0  }
 0x1ee   :  { %v367_v37 = vsel %vm366_vm3, %v365_v4, %v361_v3  ;;  %v92_v34 = vsel %vm91_vm5, %v89_v60, 0.0  ;;  %v735_v53 = vcvt.f32.s32 %v734_v16 }
 0x1ef   :  { %v370_v24 = vsel %vm369_vm6, %v367_v37, 0.0  ;;  %v94_v19 = vadd.f32 %v93_v27, %v92_v34 }
 0x1f0   :  { %699 = vmin.xlane.f32.xlu1 %v698_v14  ;;  %v738_v54 = vadd.s32 %v737_v0, %v735_v53 }
 0x1f4   :  { %714 = vmin.xlane.f32.xlu1 %v713_v50 }
 0x1f8   :  { %371 = vadd.xlane.f32.xlu1 %v370_v24 }
 0x1fc   :  { %95 = vadd.xlane.f32.xlu1 %v94_v19 }
 0x200   :  { %319 = vadd.xlane.f32.xlu1 %v318_v22 }
 0x275   :  { %v749_v41 = vpop.xlane.xlu1 %748 }
 0x276   :  { %v750_v17 = vcvt.f32.s32 %v749_v41 }
 0x278   :  { %v753_v38 = vadd.s32 %v752_v36, %v750_v17 }
 0x279   :  { %v700_v8 = vpop.xlane.xlu1 %699 }
 0x27a   :  { %v701_v11 = vcvt.f32.s32 %v700_v8 }
 0x27c   :  { %v704_v55 = vadd.s32 %v703_v59, %v701_v11 }
 0x27d   :  { %v715_v29 = vpop.xlane.xlu1 %714 }
 0x27e   :  { %v716_v12 = vcvt.f32.s32 %v715_v29  ;;  %vm754_vm4 = vcmp.eq.s32.totalorder %v704_v55, %v738_v54 }
 0x27f   :  { %v849_v44 = vsel %vm754_vm4, 1.0, %v1377_v40 }
 0x280   :  { %v719_v31 = vadd.s32 %v718_v1, %v716_v12  ;;  %v761_v46 = vsel %vm760_vm7, %v849_v44, 0.0 }
 0x281   :  { %v372_v15 = vpop.xlane.xlu1 %371 }
 0x282   :  { %v844_v33 = vadd.f32 -3.0, %v372_v15  ;;  %vm755_vm8 = vcmp.eq.s32.totalorder %v719_v31, %v753_v38 }
 0x283   :  { %v850_v7 = vsel %vm755_vm8, 1.0, %v1377_v40 }
 0x284   :  { %v374_v35 = vand.u32 2147483647, %v844_v33  ;;  %v762_v45 = vsel %vm760_vm7, %v850_v7, 0.0 }
 0x285   :  { %v96_v5 = vpop.xlane.xlu1 %95  ;;  %v763_v30 = vadd.f32 %v762_v45, %v761_v46 }
 0x286   :  { %v97_v51 = vrot.slane %v96_v5, 4  ;;  %v376_v2 = vsel %vm375_vm9, %v374_v35, 0.0 }
 0x287   :  { %377 = vadd.xlane.f32.xlu1 %v376_v2 }
 0x288   :  { %v98_v21 = vadd.f32 %v97_v51, %v96_v5 }
 0x289   :  { %v320_v62 = vpop.xlane.xlu1 %319 }
 0x28a   :  { %v99_v14 = vrot.slane %v98_v21, 2  ;;  %v321_v32 = vrot.slane %v320_v62, 4 }
 0x28b   :  { %545 = vadd.xlane.f32.xlu1 %v1288_v28 }
 0x28c   :  { %v322_v10 = vadd.f32 %v321_v32, %v320_v62  ;;  %v100_v4 = vadd.f32 %v99_v14, %v98_v21 }
 0x28e   :  { %v323_v3 = vrot.slane %v322_v10, 2  ;;  %v101_v26 = vrot.slane %v100_v4, 1 }
 0x28f   :  { %665 = vadd.xlane.f32.xlu1 %v664_v57 }
 0x290   :  { %v102_v39 = vadd.f32 %v101_v26, %v100_v4  ;;  %v324_v60 = vadd.f32 %v323_v3, %v322_v10 }
 0x292   :  { %879 = vpush %v102_v39  ;;  %v325_v61 = vrot.slane %v324_v60, 1 }
 0x293   :  { %764 = vadd.xlane.f32.xlu1 %v763_v30 }
 0x294   :  { %v326_v6 = vadd.f32 %v325_v61, %v324_v60 }
 0x296   :  { %881 = vpush %v326_v6 }
 0x297   :  { %883 = vpush %v948_v52 }
 0x2c3   :  { %s880_s5 = spop %879 }
 0x2c7   :  { %s882_s30 = spop %881 }
 0x2c8   :  { %s328_s11 = sadd.f32 %s882_s30, %s880_s5  ;;  %s1330_s12 = spop %883 }
 0x2ca   :  { %s332_s13 = smul.f32 %s1330_s12, %s328_s11 }
 0x2cc   :  { %334 = sst [smem:[#allocation3]] %s332_s13 }
 0x2cd   :  { %784 = dma.smem_to_hbm %s998_s14, 16, %s1356_s6, [#allocation4]  }
 0x310   :  { %v378_v28 = vpop.xlane.xlu1 %377 }
 0x311   :  { %v379_v50 = vrot.slane %v378_v28, 4 }
 0x313   :  { %v380_v47 = vadd.f32 %v379_v50, %v378_v28 }
 0x314   :  { %v546_v49 = vpop.xlane.xlu1 %545 }
 0x315   :  { %v381_v37 = vrot.slane %v380_v47, 2  ;;  %v547_v13 = vrot.slane %v546_v49, 4 }
 0x317   :  { %v548_v58 = vadd.f32 %v547_v13, %v546_v49  ;;  %v382_v34 = vadd.f32 %v381_v37, %v380_v47 }
 0x318   :  { %v666_v27 = vpop.xlane.xlu1 %665 }
 0x319   :  { %v549_v20 = vrot.slane %v548_v58, 2  ;;  %v667_v24 = vrot.slane %v666_v27, 4  ;;  %v383_v25 = vrot.slane %v382_v34, 1 }
 0x31b   :  { %v668_v18 = vadd.f32 %v667_v24, %v666_v27  ;;  %v384_v19 = vadd.f32 %v383_v25, %v382_v34  ;;  %v550_v56 = vadd.f32 %v549_v20, %v548_v58 }
 0x31c   :  { %v765_v63 = vpop.xlane.xlu1 %764 }
 0x31d   :  { %v669_v22 = vrot.slane %v668_v18, 2  ;;  %v766_v16 = vrot.slane %v765_v63, 4  ;;  %885 = vpush %v384_v19  ;;  %v551_v48 = vrot.slane %v550_v56, 1 }
 0x31f   :  { %v767_v41 = vadd.f32 %v766_v16, %v765_v63  ;;  %v552_v43 = vadd.f32 %v551_v48, %v550_v56  ;;  %v670_v53 = vadd.f32 %v669_v22, %v668_v18 }
 0x321   :  { %v768_v0 = vrot.slane %v767_v41, 2  ;;  %887 = vpush %v552_v43  ;;  %v671_v8 = vrot.slane %v670_v53, 1 }
 0x323   :  { %v769_v59 = vadd.f32 %v768_v0, %v767_v41  ;;  %v672_v23 = vadd.f32 %v671_v8, %v670_v53 }
 0x325   :  { %889 = vpush %v672_v23  ;;  %v770_v42 = vrot.slane %v769_v59, 1 }
 0x327   :  { %v771_v11 = vadd.f32 %v770_v42, %v769_v59 }
 0x329   :  { %891 = vpush %v771_v11 }
 0x34e   :  { %s886_s6 = spop %885 }
 0x34f   :  { %s388_s17 = smul.f32 0.5, %s886_s6 }
 0x351   :  { %390 = sst [smem:[#allocation10]] %s388_s17 }
 0x352   :  { %s888_s18 = spop %887 }
 0x353   :  { %s557_s19 = smul.f32 %s888_s18, %s1330_s12 }
 0x355   :  { %559 = sst [smem:[#allocation5]] %s557_s19 }
 0x356   :  { %s890_s20 = spop %889 }
 0x357   :  { %s677_s0 = smul.f32 %s890_s20, %s1330_s12 }
 0x358   :  { %792 = dma.smem_to_hbm %s999_s1, 16, %s1357_s7, [#allocation6]  }
 0x359   :  { %679 = sst [smem:[#allocation7]] %s677_s0 }
 0x35a   :  { %s892_s23 = spop %891 }
 0x35b   :  { %s773_s24 = smul.f32 16.666666, %s892_s23 }
 0x35c   :  { %800 = dma.smem_to_hbm %s1000_s25, 16, %s1358_s8, [#allocation6]  }
 0x35d   :  { %s774_s3 = ssub.f32 100.0, %s773_s24 }
 0x35f   :  { %776 = sst [smem:[#allocation8]] %s774_s3 }
 0x360   :  { %808 = dma.smem_to_hbm %s1001_s27, 16, %s1359_s9, [#allocation9]  }
 0x361   :  { %816 = dma.smem_to_hbm %s1002_s29, 16, %s1360_s10, [#allocation9]  }
 0x362   :  { %989 = dma.done.wait [#allocation4], 16  }
 0x363   :  { %990 = vsyncadd [#allocation4], 4294967280 }
 0x364   :  { %991 = dma.done.wait [#allocation6], 32  }
 0x365   :  { %992 = vsyncadd [#allocation6], 4294967264 }
 0x366   :  { %993 = dma.done.wait [#allocation9], 32  }
 0x367   :  { %994 = vsyncadd [#allocation9], 4294967264 }
 0x368   :  { %832 = sfence }
 0x369   :  { %833 = vsyncpa [#allocation4], 1 }
 0x36a   :  { %834 = vsyncpa [#allocation6], 1 }
 0x36b   :  { %835 = vsyncpa [#allocation9], 1 }

</bundles_post_ra>
